<compile_context>
chip_gen: v7x
topology: tpu7x:2x2x1
jax: 0.10.0
libtpu: 0.0.40
codegen_flags: <defaults>
</compile_context>

<pallas_src>
import functools

import jax
import jax.numpy as jnp
from jax.experimental import pallas as pl
from jax.experimental.pallas import tpu as pltpu


# ------------------------------------------------------------------
# Fused multi-layer LSTM stack kernel.
# Grid = (T // TT,), sequential ("arbitrary").
# x is pre-flattened to (T * B_pad, D_in) with row index = t * B_pad + b.
# ------------------------------------------------------------------
def _lstm_stack_kernel(num_layers, *refs):
    # refs layout:
    #   x_ref,
    #   [w_ih_l, w_hh_l, b_l] * num_layers,
    #   h_seq_ref, h_fin_ref, c_fin_ref,
    #   hbuf_scr, h_scr, c_scr
    x_ref = refs[0]
    w_refs = refs[1:1 + 3 * num_layers]
    h_seq_ref, h_fin_ref, c_fin_ref = refs[1 + 3 * num_layers:4 + 3 * num_layers]
    hbuf_scr, h_scr, c_scr = refs[4 + 3 * num_layers:]

    chunk = pl.program_id(0)
    n_chunks = pl.num_programs(0)

    B_pad = h_scr.shape[-2]
    H = h_scr.shape[-1]
    TT = x_ref.shape[0] // B_pad          # timesteps per chunk (static)

    @pl.when(chunk == 0)
    def _():
        h_scr[...] = jnp.zeros(h_scr.shape, h_scr.dtype)
        c_scr[...] = jnp.zeros(c_scr.shape, c_scr.dtype)

    src = x_ref                           # (TT*B_pad, D_layer)
    for layer in range(num_layers):
        w_ih = w_refs[3 * layer][...]     # (D_layer, 4H)
        w_hh = w_refs[3 * layer + 1][...] # (H, 4H)
        b = w_refs[3 * layer + 2][...]    # (1, 4H)
        # Last layer writes straight into the output block; intermediate
        # layers write the VMEM inter-layer buffer (never hits HBM).
        dst = h_seq_ref if layer == num_layers - 1 else hbuf_scr

        # Hoisted input projection for the whole chunk: one big MXU pass.
        xg = jnp.dot(src[...], w_ih, preferred_element_type=jnp.float32) + b

        h = h_scr[layer]                  # (B_pad, H) carried state
        c = c_scr[layer]
        for tt in range(TT):              # fully unrolled (TT is static, small)
            gates = xg[tt * B_pad:(tt + 1) * B_pad, :] + jnp.dot(
                h, w_hh, preferred_element_type=jnp.float32)
            i = jax.nn.sigmoid(gates[:, 0 * H:1 * H])
            f = jax.nn.sigmoid(gates[:, 1 * H:2 * H])
            g = jnp.tanh(gates[:, 2 * H:3 * H])
            o = jax.nn.sigmoid(gates[:, 3 * H:4 * H])
            c = f * c + i * g
            h = o * jnp.tanh(c)
            dst[tt * B_pad:(tt + 1) * B_pad, :] = h
        h_scr[layer] = h
        c_scr[layer] = c
        src = dst

    # Final states written once, on the last chunk only.
    @pl.when(chunk == n_chunks - 1)
    def _():
        h_fin_ref[...] = h_scr[...]
        c_fin_ref[...] = c_scr[...]


def lstm_stack(x_btd, lstm_params, hid_size):
    """x_btd: (B, T, D_in); lstm_params: list of (w_ih (D,4H), w_hh (H,4H), b (1,4H)).

    Returns h_seq (T, B, H) of the last layer and (h_n, c_n) each (L, B, H).
    """
    B, T, D_in = x_btd.shape
    H = hid_size
    L = len(lstm_params)
    B_pad = ((B + 7) // 8) * 8            # sublane-align the batch

    # Largest time-chunk size that divides T (amortizes per-grid-step overhead).
    TT = 1
    for cand in (16, 8, 4, 2, 1):
        if T % cand == 0:
            TT = cand
            break

    x = jnp.transpose(x_btd, (1, 0, 2))                    # (T, B, D_in)
    if B_pad != B:
        x = jnp.pad(x, ((0, 0), (0, B_pad - B), (0, 0)))
    x_flat = x.reshape(T * B_pad, D_in)                    # row = t*B_pad + b

    in_specs = [pl.BlockSpec((TT * B_pad, D_in), lambda c: (c, 0))]
    args = [x_flat]
    for (w_ih, w_hh, bias) in lstm_params:
        d = w_ih.shape[0]
        in_specs += [
            pl.BlockSpec((d, 4 * H), lambda c: (0, 0)),
            pl.BlockSpec((H, 4 * H), lambda c: (0, 0)),
            pl.BlockSpec((1, 4 * H), lambda c: (0, 0)),
        ]
        args += [w_ih, w_hh, bias]

    out_shape = (
        jax.ShapeDtypeStruct((T * B_pad, H), jnp.float32),   # last-layer h_seq
        jax.ShapeDtypeStruct((L, B_pad, H), jnp.float32),    # h_n
        jax.ShapeDtypeStruct((L, B_pad, H), jnp.float32),    # c_n
    )
    out_specs = [
        pl.BlockSpec((TT * B_pad, H), lambda c: (c, 0)),
        pl.BlockSpec((L, B_pad, H), lambda c: (0, 0, 0)),    # resident
        pl.BlockSpec((L, B_pad, H), lambda c: (0, 0, 0)),    # resident
    ]
    scratch_shapes = [
        pltpu.VMEM((TT * B_pad, H), jnp.float32),            # inter-layer h buffer
        pltpu.VMEM((L, B_pad, H), jnp.float32),              # h carry per layer
        pltpu.VMEM((L, B_pad, H), jnp.float32),              # c carry per layer
    ]

    h_seq_flat, h_fin, c_fin = pl.pallas_call(
        functools.partial(_lstm_stack_kernel, L),
        out_shape=out_shape,
        grid_spec=pltpu.PrefetchScalarGridSpec(
            num_scalar_prefetch=0,
            grid=(T // TT,),
            in_specs=in_specs,
            out_specs=out_specs,
            scratch_shapes=scratch_shapes,
        ),
        compiler_params=pltpu.CompilerParams(
            dimension_semantics=("arbitrary",)),
    )(*args)

    h_seq = h_seq_flat.reshape(T, B_pad, H)[:, :B, :]        # (T, B, H)
    return h_seq, h_fin[:, :B, :], c_fin[:, :B, :]


# ------------------------------------------------------------------
# Output head kernel: (lin(h) * query).sum(-1), flattened to one 2D matmul.
# ------------------------------------------------------------------
def _output_kernel(h_ref, w_ref, b_ref, q_ref, out_ref):
    # h: (N, H)  w: (H, E)  b: (1, E)  q: (N, E)  out: (N, 1)
    proj = jnp.dot(h_ref[...], w_ref[...],
                   preferred_element_type=jnp.float32) + b_ref[...]
    out_ref[...] = jnp.sum(proj * q_ref[...], axis=-1, keepdims=True)


def output_head(h_flat, w_lin_t, b_lin, q_flat):
    # TODO(synk): if B*T grows large, add a row-tile grid with a lane-dense
    # (rows, 128) output layout; at these sizes a single invocation is fine.
    N = h_flat.shape[0]
    return pl.pallas_call(
        _output_kernel,
        out_shape=jax.ShapeDtypeStruct((N, 1), jnp.float32),
        in_specs=[pl.BlockSpec(memory_space=pltpu.MemorySpace.VMEM)] * 4,
        out_specs=pl.BlockSpec(memory_space=pltpu.MemorySpace.VMEM),
    )(h_flat, w_lin_t, b_lin, q_flat)


# ------------------------------------------------------------------
# DKT2 parameter construction + forward
# ------------------------------------------------------------------
def init_dkt2_params(key, num_items, num_skills, hid_size, embed_size,
                     num_hid_layers):
    half = embed_size // 2
    keys = jax.random.split(key, 4 + 4 * num_hid_layers)

    def unif(k, shape, bound):
        return jax.random.uniform(k, shape, jnp.float32, -bound, bound)

    item_emb = jax.random.normal(keys[0], (num_items + 1, half), jnp.float32)
    skill_emb = jax.random.normal(keys[1], (num_skills + 1, half), jnp.float32)
    # padding_idx=0 -> zero row
    item_emb = item_emb.at[0].set(0.0)
    skill_emb = skill_emb.at[0].set(0.0)

    k_bound = 1.0 / jnp.sqrt(hid_size)
    lstm = []
    for layer in range(num_hid_layers):
        d_in = 2 * embed_size if layer == 0 else hid_size
        kw = keys[4 + 4 * layer: 8 + 4 * layer]
        w_ih = unif(kw[0], (d_in, 4 * hid_size), k_bound)       # (D_in, 4H)
        w_hh = unif(kw[1], (hid_size, 4 * hid_size), k_bound)   # (H, 4H)
        b_ih = unif(kw[2], (4 * hid_size,), k_bound)
        b_hh = unif(kw[3], (4 * hid_size,), k_bound)
        bias = (b_ih + b_hh).reshape(1, 4 * hid_size)
        lstm.append((w_ih, w_hh, bias))

    lin_bound = 1.0 / jnp.sqrt(hid_size)
    w_lin = unif(keys[2], (embed_size, hid_size), lin_bound)    # PyTorch (E, H)
    b_lin = unif(keys[3], (embed_size,), lin_bound).reshape(1, embed_size)

    return dict(item_emb=item_emb, skill_emb=skill_emb, lstm=lstm,
                w_lin=w_lin, b_lin=b_lin, embed_size=embed_size,
                hid_size=hid_size)


def dkt2_forward(params, item_inputs, skill_inputs, label_inputs,
                 item_ids, skill_ids):
    E = params["embed_size"]
    H = params["hid_size"]
    B, T = item_inputs.shape

    # --- get_inputs (glue) ---
    it_e = jnp.take(params["item_emb"], item_inputs, axis=0)     # (B,T,E/2)
    sk_e = jnp.take(params["skill_emb"], skill_inputs, axis=0)   # (B,T,E/2)
    lab = label_inputs[..., None].astype(jnp.float32)            # (B,T,1)
    inputs = jnp.concatenate([it_e, sk_e, it_e, sk_e], axis=-1)  # (B,T,2E)
    inputs = jnp.concatenate(
        [inputs[..., :E] * lab, inputs[..., E:] * (1.0 - lab)], axis=-1)

    # --- query (glue) ---
    q_it = jnp.take(params["item_emb"], item_ids, axis=0)
    q_sk = jnp.take(params["skill_emb"], skill_ids, axis=0)
    query = jnp.concatenate([q_it, q_sk], axis=-1)               # (B,T,E)

    # --- fused multi-layer LSTM stack (single Pallas kernel) ---
    h_seq, h_n, c_n = lstm_stack(inputs, params["lstm"], H)      # (T,B,H),(L,B,H)x2
    hidden = (h_n, c_n)

    # --- dropout (identity at inference) + linear + query dot (Pallas) ---
    h_flat = jnp.transpose(h_seq, (1, 0, 2)).reshape(B * T, H)   # row = b*T + t
    q_flat = query.reshape(B * T, E)
    out_flat = output_head(h_flat, params["w_lin"].T, params["b_lin"], q_flat)
    output = out_flat.reshape(B, T)
    return output, hidden


# ------------------------------------------------------------------
if __name__ == "__main__":
    num_items, num_skills = 20, 10
    hid_size, embed_size = 32, 32
    num_hid_layers, drop_prob = 2, 0.25
    B, T = 2, 8

    params = init_dkt2_params(jax.random.PRNGKey(42), num_items, num_skills,
                              hid_size, embed_size, num_hid_layers)

    key = jax.random.PRNGKey(0)
    k1, k2, k3, k4, k5 = jax.random.split(key, 5)
    item_inputs = jax.random.randint(k1, (B, T), 0, num_items + 1)
    skill_inputs = jax.random.randint(k2, (B, T), 0, num_skills + 1)
    label_inputs = jax.random.randint(k3, (B, T), 0, 2)
    item_ids = jax.random.randint(k4, (B, T), 1, num_items + 1)
    skill_ids = jax.random.randint(k5, (B, T), 1, num_skills + 1)

    fwd = jax.jit(functools.partial(dkt2_forward, params))
    output, hidden = fwd(item_inputs, skill_inputs, label_inputs,
                         item_ids, skill_ids)
    jax.block_until_ready((output, hidden))

    assert output.shape == (B, T)
    assert hidden[0].shape == (num_hid_layers, B, hid_size)
    assert hidden[1].shape == (num_hid_layers, B, hid_size)
    print("KERNEL_OK")
</pallas_src>

<mosaic_0001>
module attributes {stable_mosaic.version = 11 : i64} {
  func.func @_output_kernel(%arg0: memref<16x32xf32, #tpu.memory_space<vmem>>, %arg1: memref<32x32xf32, #tpu.memory_space<vmem>>, %arg2: memref<1x32xf32, #tpu.memory_space<vmem>>, %arg3: memref<16x32xf32, #tpu.memory_space<vmem>>, %arg4: memref<16x1xf32, #tpu.memory_space<vmem>>) attributes {dimension_semantics = [], scalar_prefetch = 0 : i64, scratch_operands = 0 : i64, tpu.core_type = #tpu.core_type<tc>} {
    %c0 = arith.constant 0 : index
    %c0_0 = arith.constant 0 : index
    %0 = vector.load %arg0[%c0, %c0_0] : memref<16x32xf32, #tpu.memory_space<vmem>>, vector<16x32xf32>
    %c0_1 = arith.constant 0 : index
    %c0_2 = arith.constant 0 : index
    %1 = vector.load %arg1[%c0_1, %c0_2] : memref<32x32xf32, #tpu.memory_space<vmem>>, vector<32x32xf32>
    %cst = arith.constant dense<0.000000e+00> : vector<16x32xf32>
    %2 = tpu.matmul %0, %1, %cst {dimension_numbers = #tpu.dot_dimension_numbers<[1], [0], [0], [1], [0, 0, 1, 1], [], []>} : vector<16x32xf32>, vector<32x32xf32>, vector<16x32xf32> -> vector<16x32xf32>
    %c0_3 = arith.constant 0 : index
    %c0_4 = arith.constant 0 : index
    %3 = vector.load %arg2[%c0_3, %c0_4] : memref<1x32xf32, #tpu.memory_space<vmem>>, vector<1x32xf32>
    %4 = vector.broadcast %3 : vector<1x32xf32> to vector<16x32xf32>
    %5 = arith.addf %2, %4 : vector<16x32xf32>
    %c0_5 = arith.constant 0 : index
    %c0_6 = arith.constant 0 : index
    %6 = vector.load %arg3[%c0_5, %c0_6] : memref<16x32xf32, #tpu.memory_space<vmem>>, vector<16x32xf32>
    %7 = arith.mulf %5, %6 : vector<16x32xf32>
    %cst_7 = arith.constant dense<0.000000e+00> : vector<16xf32>
    %8 = vector.multi_reduction <add>, %7, %cst_7 [1] : vector<16x32xf32> to vector<16xf32>
    %9 = vector.shape_cast %8 : vector<16xf32> to vector<16x1xf32>
    %c0_8 = arith.constant 0 : index
    %c0_9 = arith.constant 0 : index
    %10 = vector.load %arg4[%c0_8, %c0_9] : memref<16x1xf32, #tpu.memory_space<vmem>>, vector<16x1xf32>
    tpu.vector_store %arg4[%c0_8, %c0_9], %9 {strides = array<i32>} : memref<16x1xf32, #tpu.memory_space<vmem>>, vector<16x1xf32>,
    return
  }
}

module attributes {stable_mosaic.version = 11 : i64} {
  func.func @_lstm_stack_kernel(%arg0: i32, %arg1: memref<64x64xf32, #tpu.memory_space<vmem>>, %arg2: memref<64x128xf32, #tpu.memory_space<vmem>>, %arg3: memref<32x128xf32, #tpu.memory_space<vmem>>, %arg4: memref<1x128xf32, #tpu.memory_space<vmem>>, %arg5: memref<32x128xf32, #tpu.memory_space<vmem>>, %arg6: memref<32x128xf32, #tpu.memory_space<vmem>>, %arg7: memref<1x128xf32, #tpu.memory_space<vmem>>, %arg8: memref<64x32xf32, #tpu.memory_space<vmem>>, %arg9: memref<2x8x32xf32, #tpu.memory_space<vmem>>, %arg10: memref<2x8x32xf32, #tpu.memory_space<vmem>>, %arg11: memref<64x32xf32, #tpu.memory_space<vmem>>, %arg12: memref<2x8x32xf32, #tpu.memory_space<vmem>>, %arg13: memref<2x8x32xf32, #tpu.memory_space<vmem>>) attributes {dimension_semantics = [#tpu.dimension_semantics<arbitrary>], iteration_bounds = array<i64: 1>, scalar_prefetch = 0 : i64, scratch_operands = 3 : i64, tpu.core_type = #tpu.core_type<tc>, window_params = [{transform_indices = @transform_0, window_bounds = array<i64: 64, 64>}, {pipeline_mode = #tpu.pipeline_mode<synchronous>, transform_indices = @transform_1, window_bounds = array<i64: 64, 128>}, {pipeline_mode = #tpu.pipeline_mode<synchronous>, transform_indices = @transform_2, window_bounds = array<i64: 32, 128>}, {pipeline_mode = #tpu.pipeline_mode<synchronous>, transform_indices = @transform_3, window_bounds = array<i64: 1, 128>}, {pipeline_mode = #tpu.pipeline_mode<synchronous>, transform_indices = @transform_4, window_bounds = array<i64: 32, 128>}, {pipeline_mode = #tpu.pipeline_mode<synchronous>, transform_indices = @transform_5, window_bounds = array<i64: 32, 128>}, {pipeline_mode = #tpu.pipeline_mode<synchronous>, transform_indices = @transform_6, window_bounds = array<i64: 1, 128>}, {transform_indices = @transform_7, window_bounds = array<i64: 64, 32>}, {pipeline_mode = #tpu.pipeline_mode<synchronous>, transform_indices = @transform_8, window_bounds = array<i64: 2, 8, 32>}, {pipeline_mode = #tpu.pipeline_mode<synchronous>, transform_indices = @transform_9, window_bounds = array<i64: 2, 8, 32>}]} {
    %c0_i32 = arith.constant 0 : i32
    %0 = arith.cmpi eq, %arg0, %c0_i32 : i32
    %1 = arith.extui %0 : i1 to i32
    %c0_i32_0 = arith.constant 0 : i32
    %2 = arith.cmpi ne, %1, %c0_i32_0 : i32
    scf.if %2 {
      %cst_131 = arith.constant 0.000000e+00 : f32
      %504 = vector.broadcast %cst_131 : f32 to vector<2x8x32xf32>
      %c0_132 = arith.constant 0 : index
      %c0_133 = arith.constant 0 : index
      %c0_134 = arith.constant 0 : index
      %505 = vector.load %arg12[%c0_132, %c0_133, %c0_134] : memref<2x8x32xf32, #tpu.memory_space<vmem>>, vector<2x8x32xf32>
      tpu.vector_store %arg12[%c0_132, %c0_133, %c0_134], %504 {strides = array<i32>} : memref<2x8x32xf32, #tpu.memory_space<vmem>>, vector<2x8x32xf32>,
      %cst_135 = arith.constant 0.000000e+00 : f32
      %506 = vector.broadcast %cst_135 : f32 to vector<2x8x32xf32>
      %c0_136 = arith.constant 0 : index
      %c0_137 = arith.constant 0 : index
      %c0_138 = arith.constant 0 : index
      %507 = vector.load %arg13[%c0_136, %c0_137, %c0_138] : memref<2x8x32xf32, #tpu.memory_space<vmem>>, vector<2x8x32xf32>
      tpu.vector_store %arg13[%c0_136, %c0_137, %c0_138], %506 {strides = array<i32>} : memref<2x8x32xf32, #tpu.memory_space<vmem>>, vector<2x8x32xf32>,
    } else {
    }
    %c0 = arith.constant 0 : index
    %c0_1 = arith.constant 0 : index
    %3 = vector.load %arg2[%c0, %c0_1] : memref<64x128xf32, #tpu.memory_space<vmem>>, vector<64x128xf32>
    %c0_2 = arith.constant 0 : index
    %c0_3 = arith.constant 0 : index
    %4 = vector.load %arg3[%c0_2, %c0_3] : memref<32x128xf32, #tpu.memory_space<vmem>>, vector<32x128xf32>
    %c0_4 = arith.constant 0 : index
    %c0_5 = arith.constant 0 : index
    %5 = vector.load %arg4[%c0_4, %c0_5] : memref<1x128xf32, #tpu.memory_space<vmem>>, vector<1x128xf32>
    %c0_6 = arith.constant 0 : index
    %c0_7 = arith.constant 0 : index
    %6 = vector.load %arg1[%c0_6, %c0_7] : memref<64x64xf32, #tpu.memory_space<vmem>>, vector<64x64xf32>
    %cst = arith.constant dense<0.000000e+00> : vector<64x128xf32>
    %7 = tpu.matmul %6, %3, %cst {dimension_numbers = #tpu.dot_dimension_numbers<[1], [0], [0], [1], [0, 0, 1, 1], [], []>} : vector<64x64xf32>, vector<64x128xf32>, vector<64x128xf32> -> vector<64x128xf32>
    %8 = vector.broadcast %5 : vector<1x128xf32> to vector<64x128xf32>
    %9 = arith.addf %7, %8 : vector<64x128xf32>
    %c0_8 = arith.constant 0 : index
    %c0_9 = arith.constant 0 : index
    %c0_10 = arith.constant 0 : index
    %10 = vector.load %arg12[%c0_8, %c0_9, %c0_10] : memref<2x8x32xf32, #tpu.memory_space<vmem>>, vector<1x8x32xf32>
    %11 = vector.shape_cast %10 : vector<1x8x32xf32> to vector<8x32xf32>
    %c0_11 = arith.constant 0 : index
    %c0_12 = arith.constant 0 : index
    %c0_13 = arith.constant 0 : index
    %12 = vector.load %arg13[%c0_11, %c0_12, %c0_13] : memref<2x8x32xf32, #tpu.memory_space<vmem>>, vector<1x8x32xf32>
    %13 = vector.shape_cast %12 : vector<1x8x32xf32> to vector<8x32xf32>
    %14 = vector.extract_strided_slice %9 {offsets = [0, 0], sizes = [8, 128], strides = [1, 1]} : vector<64x128xf32> to vector<8x128xf32>
    %cst_14 = arith.constant dense<0.000000e+00> : vector<8x128xf32>
    %15 = tpu.matmul %11, %4, %cst_14 {dimension_numbers = #tpu.dot_dimension_numbers<[1], [0], [0], [1], [0, 0, 1, 1], [], []>} : vector<8x32xf32>, vector<32x128xf32>, vector<8x128xf32> -> vector<8x128xf32>
    %16 = arith.addf %14, %15 : vector<8x128xf32>
    %17 = vector.extract_strided_slice %16 {offsets = [0, 0], sizes = [8, 32], strides = [1, 1]} : vector<8x128xf32> to vector<8x32xf32>
    %18 = arith.negf %17 : vector<8x32xf32>
    %19 = math.exp %18 : vector<8x32xf32>
    %cst_15 = arith.constant 1.000000e+00 : f32
    %20 = vector.broadcast %cst_15 : f32 to vector<8x32xf32>
    %21 = arith.addf %20, %19 : vector<8x32xf32>
    %22 = arith.divf %20, %21 : vector<8x32xf32>
    %23 = vector.extract_strided_slice %16 {offsets = [0, 32], sizes = [8, 32], strides = [1, 1]} : vector<8x128xf32> to vector<8x32xf32>
    %24 = arith.negf %23 : vector<8x32xf32>
    %25 = math.exp %24 : vector<8x32xf32>
    %cst_16 = arith.constant 1.000000e+00 : f32
    %26 = vector.broadcast %cst_16 : f32 to vector<8x32xf32>
    %27 = arith.addf %26, %25 : vector<8x32xf32>
    %28 = arith.divf %26, %27 : vector<8x32xf32>
    %29 = vector.extract_strided_slice %16 {offsets = [0, 64], sizes = [8, 32], strides = [1, 1]} : vector<8x128xf32> to vector<8x32xf32>
    %30 = math.tanh %29 : vector<8x32xf32>
    %31 = vector.extract_strided_slice %16 {offsets = [0, 96], sizes = [8, 32], strides = [1, 1]} : vector<8x128xf32> to vector<8x32xf32>
    %32 = arith.negf %31 : vector<8x32xf32>
    %33 = math.exp %32 : vector<8x32xf32>
    %cst_17 = arith.constant 1.000000e+00 : f32
    %34 = vector.broadcast %cst_17 : f32 to vector<8x32xf32>
    %35 = arith.addf %34, %33 : vector<8x32xf32>
    %36 = arith.divf %34, %35 : vector<8x32xf32>
    %37 = arith.mulf %28, %13 : vector<8x32xf32>
    %38 = arith.mulf %22, %30 : vector<8x32xf32>
    %39 = arith.addf %37, %38 : vector<8x32xf32>
    %40 = math.tanh %39 : vector<8x32xf32>
    %41 = arith.mulf %36, %40 : vector<8x32xf32>
    %c0_18 = arith.constant 0 : index
    %c0_19 = arith.constant 0 : index
    %42 = vector.load %arg11[%c0_18, %c0_19] : memref<64x32xf32, #tpu.memory_space<vmem>>, vector<8x32xf32>
    tpu.vector_store %arg11[%c0_18, %c0_19], %41 {strides = array<i32>} : memref<64x32xf32, #tpu.memory_space<vmem>>, vector<8x32xf32>,
    %43 = vector.extract_strided_slice %9 {offsets = [8, 0], sizes = [8, 128], strides = [1, 1]} : vector<64x128xf32> to vector<8x128xf32>
    %cst_20 = arith.constant dense<0.000000e+00> : vector<8x128xf32>
    %44 = tpu.matmul %41, %4, %cst_20 {dimension_numbers = #tpu.dot_dimension_numbers<[1], [0], [0], [1], [0, 0, 1, 1], [], []>} : vector<8x32xf32>, vector<32x128xf32>, vector<8x128xf32> -> vector<8x128xf32>
    %45 = arith.addf %43, %44 : vector<8x128xf32>
    %46 = vector.extract_strided_slice %45 {offsets = [0, 0], sizes = [8, 32], strides = [1, 1]} : vector<8x128xf32> to vector<8x32xf32>
    %47 = arith.negf %46 : vector<8x32xf32>
    %48 = math.exp %47 : vector<8x32xf32>
    %cst_21 = arith.constant 1.000000e+00 : f32
    %49 = vector.broadcast %cst_21 : f32 to vector<8x32xf32>
    %50 = arith.addf %49, %48 : vector<8x32xf32>
    %51 = arith.divf %49, %50 : vector<8x32xf32>
    %52 = vector.extract_strided_slice %45 {offsets = [0, 32], sizes = [8, 32], strides = [1, 1]} : vector<8x128xf32> to vector<8x32xf32>
    %53 = arith.negf %52 : vector<8x32xf32>
    %54 = math.exp %53 : vector<8x32xf32>
    %cst_22 = arith.constant 1.000000e+00 : f32
    %55 = vector.broadcast %cst_22 : f32 to vector<8x32xf32>
    %56 = arith.addf %55, %54 : vector<8x32xf32>
    %57 = arith.divf %55, %56 : vector<8x32xf32>
    %58 = vector.extract_strided_slice %45 {offsets = [0, 64], sizes = [8, 32], strides = [1, 1]} : vector<8x128xf32> to vector<8x32xf32>
    %59 = math.tanh %58 : vector<8x32xf32>
    %60 = vector.extract_strided_slice %45 {offsets = [0, 96], sizes = [8, 32], strides = [1, 1]} : vector<8x128xf32> to vector<8x32xf32>
    %61 = arith.negf %60 : vector<8x32xf32>
    %62 = math.exp %61 : vector<8x32xf32>
    %cst_23 = arith.constant 1.000000e+00 : f32
    %63 = vector.broadcast %cst_23 : f32 to vector<8x32xf32>
    %64 = arith.addf %63, %62 : vector<8x32xf32>
    %65 = arith.divf %63, %64 : vector<8x32xf32>
    %66 = arith.mulf %57, %39 : vector<8x32xf32>
    %67 = arith.mulf %51, %59 : vector<8x32xf32>
    %68 = arith.addf %66, %67 : vector<8x32xf32>
    %69 = math.tanh %68 : vector<8x32xf32>
    %70 = arith.mulf %65, %69 : vector<8x32xf32>
    %c8 = arith.constant 8 : index
    %c0_24 = arith.constant 0 : index
    %71 = vector.load %arg11[%c8, %c0_24] : memref<64x32xf32, #tpu.memory_space<vmem>>, vector<8x32xf32>
    tpu.vector_store %arg11[%c8, %c0_24], %70 {strides = array<i32>} : memref<64x32xf32, #tpu.memory_space<vmem>>, vector<8x32xf32>,
    %72 = vector.extract_strided_slice %9 {offsets = [16, 0], sizes = [8, 128], strides = [1, 1]} : vector<64x128xf32> to vector<8x128xf32>
    %cst_25 = arith.constant dense<0.000000e+00> : vector<8x128xf32>
    %73 = tpu.matmul %70, %4, %cst_25 {dimension_numbers = #tpu.dot_dimension_numbers<[1], [0], [0], [1], [0, 0, 1, 1], [], []>} : vector<8x32xf32>, vector<32x128xf32>, vector<8x128xf32> -> vector<8x128xf32>
    %74 = arith.addf %72, %73 : vector<8x128xf32>
    %75 = vector.extract_strided_slice %74 {offsets = [0, 0], sizes = [8, 32], strides = [1, 1]} : vector<8x128xf32> to vector<8x32xf32>
    %76 = arith.negf %75 : vector<8x32xf32>
    %77 = math.exp %76 : vector<8x32xf32>
    %cst_26 = arith.constant 1.000000e+00 : f32
    %78 = vector.broadcast %cst_26 : f32 to vector<8x32xf32>
    %79 = arith.addf %78, %77 : vector<8x32xf32>
    %80 = arith.divf %78, %79 : vector<8x32xf32>
    %81 = vector.extract_strided_slice %74 {offsets = [0, 32], sizes = [8, 32], strides = [1, 1]} : vector<8x128xf32> to vector<8x32xf32>
    %82 = arith.negf %81 : vector<8x32xf32>
    %83 = math.exp %82 : vector<8x32xf32>
    %cst_27 = arith.constant 1.000000e+00 : f32
    %84 = vector.broadcast %cst_27 : f32 to vector<8x32xf32>
    %85 = arith.addf %84, %83 : vector<8x32xf32>
    %86 = arith.divf %84, %85 : vector<8x32xf32>
    %87 = vector.extract_strided_slice %74 {offsets = [0, 64], sizes = [8, 32], strides = [1, 1]} : vector<8x128xf32> to vector<8x32xf32>
    %88 = math.tanh %87 : vector<8x32xf32>
    %89 = vector.extract_strided_slice %74 {offsets = [0, 96], sizes = [8, 32], strides = [1, 1]} : vector<8x128xf32> to vector<8x32xf32>
    %90 = arith.negf %89 : vector<8x32xf32>
    %91 = math.exp %90 : vector<8x32xf32>
    %cst_28 = arith.constant 1.000000e+00 : f32
    %92 = vector.broadcast %cst_28 : f32 to vector<8x32xf32>
    %93 = arith.addf %92, %91 : vector<8x32xf32>
    %94 = arith.divf %92, %93 : vector<8x32xf32>
    %95 = arith.mulf %86, %68 : vector<8x32xf32>
    %96 = arith.mulf %80, %88 : vector<8x32xf32>
    %97 = arith.addf %95, %96 : vector<8x32xf32>
    %98 = math.tanh %97 : vector<8x32xf32>
    %99 = arith.mulf %94, %98 : vector<8x32xf32>
    %c16 = arith.constant 16 : index
    %c0_29 = arith.constant 0 : index
    %100 = vector.load %arg11[%c16, %c0_29] : memref<64x32xf32, #tpu.memory_space<vmem>>, vector<8x32xf32>
    tpu.vector_store %arg11[%c16, %c0_29], %99 {strides = array<i32>} : memref<64x32xf32, #tpu.memory_space<vmem>>, vector<8x32xf32>,
    %101 = vector.extract_strided_slice %9 {offsets = [24, 0], sizes = [8, 128], strides = [1, 1]} : vector<64x128xf32> to vector<8x128xf32>
    %cst_30 = arith.constant dense<0.000000e+00> : vector<8x128xf32>
    %102 = tpu.matmul %99, %4, %cst_30 {dimension_numbers = #tpu.dot_dimension_numbers<[1], [0], [0], [1], [0, 0, 1, 1], [], []>} : vector<8x32xf32>, vector<32x128xf32>, vector<8x128xf32> -> vector<8x128xf32>
    %103 = arith.addf %101, %102 : vector<8x128xf32>
    %104 = vector.extract_strided_slice %103 {offsets = [0, 0], sizes = [8, 32], strides = [1, 1]} : vector<8x128xf32> to vector<8x32xf32>
    %105 = arith.negf %104 : vector<8x32xf32>
    %106 = math.exp %105 : vector<8x32xf32>
    %cst_31 = arith.constant 1.000000e+00 : f32
    %107 = vector.broadcast %cst_31 : f32 to vector<8x32xf32>
    %108 = arith.addf %107, %106 : vector<8x32xf32>
    %109 = arith.divf %107, %108 : vector<8x32xf32>
    %110 = vector.extract_strided_slice %103 {offsets = [0, 32], sizes = [8, 32], strides = [1, 1]} : vector<8x128xf32> to vector<8x32xf32>
    %111 = arith.negf %110 : vector<8x32xf32>
    %112 = math.exp %111 : vector<8x32xf32>
    %cst_32 = arith.constant 1.000000e+00 : f32
    %113 = vector.broadcast %cst_32 : f32 to vector<8x32xf32>
    %114 = arith.addf %113, %112 : vector<8x32xf32>
    %115 = arith.divf %113, %114 : vector<8x32xf32>
    %116 = vector.extract_strided_slice %103 {offsets = [0, 64], sizes = [8, 32], strides = [1, 1]} : vector<8x128xf32> to vector<8x32xf32>
    %117 = math.tanh %116 : vector<8x32xf32>
    %118 = vector.extract_strided_slice %103 {offsets = [0, 96], sizes = [8, 32], strides = [1, 1]} : vector<8x128xf32> to vector<8x32xf32>
    %119 = arith.negf %118 : vector<8x32xf32>
    %120 = math.exp %119 : vector<8x32xf32>
    %cst_33 = arith.constant 1.000000e+00 : f32
    %121 = vector.broadcast %cst_33 : f32 to vector<8x32xf32>
    %122 = arith.addf %121, %120 : vector<8x32xf32>
    %123 = arith.divf %121, %122 : vector<8x32xf32>
    %124 = arith.mulf %115, %97 : vector<8x32xf32>
    %125 = arith.mulf %109, %117 : vector<8x32xf32>
    %126 = arith.addf %124, %125 : vector<8x32xf32>
    %127 = math.tanh %126 : vector<8x32xf32>
    %128 = arith.mulf %123, %127 : vector<8x32xf32>
    %c24 = arith.constant 24 : index
    %c0_34 = arith.constant 0 : index
    %129 = vector.load %arg11[%c24, %c0_34] : memref<64x32xf32, #tpu.memory_space<vmem>>, vector<8x32xf32>
    tpu.vector_store %arg11[%c24, %c0_34], %128 {strides = array<i32>} : memref<64x32xf32, #tpu.memory_space<vmem>>, vector<8x32xf32>,
    %130 = vector.extract_strided_slice %9 {offsets = [32, 0], sizes = [8, 128], strides = [1, 1]} : vector<64x128xf32> to vector<8x128xf32>
    %cst_35 = arith.constant dense<0.000000e+00> : vector<8x128xf32>
    %131 = tpu.matmul %128, %4, %cst_35 {dimension_numbers = #tpu.dot_dimension_numbers<[1], [0], [0], [1], [0, 0, 1, 1], [], []>} : vector<8x32xf32>, vector<32x128xf32>, vector<8x128xf32> -> vector<8x128xf32>
    %132 = arith.addf %130, %131 : vector<8x128xf32>
    %133 = vector.extract_strided_slice %132 {offsets = [0, 0], sizes = [8, 32], strides = [1, 1]} : vector<8x128xf32> to vector<8x32xf32>
    %134 = arith.negf %133 : vector<8x32xf32>
    %135 = math.exp %134 : vector<8x32xf32>
    %cst_36 = arith.constant 1.000000e+00 : f32
    %136 = vector.broadcast %cst_36 : f32 to vector<8x32xf32>
    %137 = arith.addf %136, %135 : vector<8x32xf32>
    %138 = arith.divf %136, %137 : vector<8x32xf32>
    %139 = vector.extract_strided_slice %132 {offsets = [0, 32], sizes = [8, 32], strides = [1, 1]} : vector<8x128xf32> to vector<8x32xf32>
    %140 = arith.negf %139 : vector<8x32xf32>
    %141 = math.exp %140 : vector<8x32xf32>
    %cst_37 = arith.constant 1.000000e+00 : f32
    %142 = vector.broadcast %cst_37 : f32 to vector<8x32xf32>
    %143 = arith.addf %142, %141 : vector<8x32xf32>
    %144 = arith.divf %142, %143 : vector<8x32xf32>
    %145 = vector.extract_strided_slice %132 {offsets = [0, 64], sizes = [8, 32], strides = [1, 1]} : vector<8x128xf32> to vector<8x32xf32>
    %146 = math.tanh %145 : vector<8x32xf32>
    %147 = vector.extract_strided_slice %132 {offsets = [0, 96], sizes = [8, 32], strides = [1, 1]} : vector<8x128xf32> to vector<8x32xf32>
    %148 = arith.negf %147 : vector<8x32xf32>
    %149 = math.exp %148 : vector<8x32xf32>
    %cst_38 = arith.constant 1.000000e+00 : f32
    %150 = vector.broadcast %cst_38 : f32 to vector<8x32xf32>
    %151 = arith.addf %150, %149 : vector<8x32xf32>
    %152 = arith.divf %150, %151 : vector<8x32xf32>
    %153 = arith.mulf %144, %126 : vector<8x32xf32>
    %154 = arith.mulf %138, %146 : vector<8x32xf32>
    %155 = arith.addf %153, %154 : vector<8x32xf32>
    %156 = math.tanh %155 : vector<8x32xf32>
    %157 = arith.mulf %152, %156 : vector<8x32xf32>
    %c32 = arith.constant 32 : index
    %c0_39 = arith.constant 0 : index
    %158 = vector.load %arg11[%c32, %c0_39] : memref<64x32xf32, #tpu.memory_space<vmem>>, vector<8x32xf32>
    tpu.vector_store %arg11[%c32, %c0_39], %157 {strides = array<i32>} : memref<64x32xf32, #tpu.memory_space<vmem>>, vector<8x32xf32>,
    %159 = vector.extract_strided_slice %9 {offsets = [40, 0], sizes = [8, 128], strides = [1, 1]} : vector<64x128xf32> to vector<8x128xf32>
    %cst_40 = arith.constant dense<0.000000e+00> : vector<8x128xf32>
    %160 = tpu.matmul %157, %4, %cst_40 {dimension_numbers = #tpu.dot_dimension_numbers<[1], [0], [0], [1], [0, 0, 1, 1], [], []>} : vector<8x32xf32>, vector<32x128xf32>, vector<8x128xf32> -> vector<8x128xf32>
    %161 = arith.addf %159, %160 : vector<8x128xf32>
    %162 = vector.extract_strided_slice %161 {offsets = [0, 0], sizes = [8, 32], strides = [1, 1]} : vector<8x128xf32> to vector<8x32xf32>
    %163 = arith.negf %162 : vector<8x32xf32>
    %164 = math.exp %163 : vector<8x32xf32>
    %cst_41 = arith.constant 1.000000e+00 : f32
    %165 = vector.broadcast %cst_41 : f32 to vector<8x32xf32>
    %166 = arith.addf %165, %164 : vector<8x32xf32>
    %167 = arith.divf %165, %166 : vector<8x32xf32>
    %168 = vector.extract_strided_slice %161 {offsets = [0, 32], sizes = [8, 32], strides = [1, 1]} : vector<8x128xf32> to vector<8x32xf32>
    %169 = arith.negf %168 : vector<8x32xf32>
    %170 = math.exp %169 : vector<8x32xf32>
    %cst_42 = arith.constant 1.000000e+00 : f32
    %171 = vector.broadcast %cst_42 : f32 to vector<8x32xf32>
    %172 = arith.addf %171, %170 : vector<8x32xf32>
    %173 = arith.divf %171, %172 : vector<8x32xf32>
    %174 = vector.extract_strided_slice %161 {offsets = [0, 64], sizes = [8, 32], strides = [1, 1]} : vector<8x128xf32> to vector<8x32xf32>
    %175 = math.tanh %174 : vector<8x32xf32>
    %176 = vector.extract_strided_slice %161 {offsets = [0, 96], sizes = [8, 32], strides = [1, 1]} : vector<8x128xf32> to vector<8x32xf32>
    %177 = arith.negf %176 : vector<8x32xf32>
    %178 = math.exp %177 : vector<8x32xf32>
    %cst_43 = arith.constant 1.000000e+00 : f32
    %179 = vector.broadcast %cst_43 : f32 to vector<8x32xf32>
    %180 = arith.addf %179, %178 : vector<8x32xf32>
    %181 = arith.divf %179, %180 : vector<8x32xf32>
    %182 = arith.mulf %173, %155 : vector<8x32xf32>
    %183 = arith.mulf %167, %175 : vector<8x32xf32>
    %184 = arith.addf %182, %183 : vector<8x32xf32>
    %185 = math.tanh %184 : vector<8x32xf32>
    %186 = arith.mulf %181, %185 : vector<8x32xf32>
    %c40 = arith.constant 40 : index
    %c0_44 = arith.constant 0 : index
    %187 = vector.load %arg11[%c40, %c0_44] : memref<64x32xf32, #tpu.memory_space<vmem>>, vector<8x32xf32>
    tpu.vector_store %arg11[%c40, %c0_44], %186 {strides = array<i32>} : memref<64x32xf32, #tpu.memory_space<vmem>>, vector<8x32xf32>,
    %188 = vector.extract_strided_slice %9 {offsets = [48, 0], sizes = [8, 128], strides = [1, 1]} : vector<64x128xf32> to vector<8x128xf32>
    %cst_45 = arith.constant dense<0.000000e+00> : vector<8x128xf32>
    %189 = tpu.matmul %186, %4, %cst_45 {dimension_numbers = #tpu.dot_dimension_numbers<[1], [0], [0], [1], [0, 0, 1, 1], [], []>} : vector<8x32xf32>, vector<32x128xf32>, vector<8x128xf32> -> vector<8x128xf32>
    %190 = arith.addf %188, %189 : vector<8x128xf32>
    %191 = vector.extract_strided_slice %190 {offsets = [0, 0], sizes = [8, 32], strides = [1, 1]} : vector<8x128xf32> to vector<8x32xf32>
    %192 = arith.negf %191 : vector<8x32xf32>
    %193 = math.exp %192 : vector<8x32xf32>
    %cst_46 = arith.constant 1.000000e+00 : f32
    %194 = vector.broadcast %cst_46 : f32 to vector<8x32xf32>
    %195 = arith.addf %194, %193 : vector<8x32xf32>
    %196 = arith.divf %194, %195 : vector<8x32xf32>
    %197 = vector.extract_strided_slice %190 {offsets = [0, 32], sizes = [8, 32], strides = [1, 1]} : vector<8x128xf32> to vector<8x32xf32>
    %198 = arith.negf %197 : vector<8x32xf32>
    %199 = math.exp %198 : vector<8x32xf32>
    %cst_47 = arith.constant 1.000000e+00 : f32
    %200 = vector.broadcast %cst_47 : f32 to vector<8x32xf32>
    %201 = arith.addf %200, %199 : vector<8x32xf32>
    %202 = arith.divf %200, %201 : vector<8x32xf32>
    %203 = vector.extract_strided_slice %190 {offsets = [0, 64], sizes = [8, 32], strides = [1, 1]} : vector<8x128xf32> to vector<8x32xf32>
    %204 = math.tanh %203 : vector<8x32xf32>
    %205 = vector.extract_strided_slice %190 {offsets = [0, 96], sizes = [8, 32], strides = [1, 1]} : vector<8x128xf32> to vector<8x32xf32>
    %206 = arith.negf %205 : vector<8x32xf32>
    %207 = math.exp %206 : vector<8x32xf32>
    %cst_48 = arith.constant 1.000000e+00 : f32
    %208 = vector.broadcast %cst_48 : f32 to vector<8x32xf32>
    %209 = arith.addf %208, %207 : vector<8x32xf32>
    %210 = arith.divf %208, %209 : vector<8x32xf32>
    %211 = arith.mulf %202, %184 : vector<8x32xf32>
    %212 = arith.mulf %196, %204 : vector<8x32xf32>
    %213 = arith.addf %211, %212 : vector<8x32xf32>
    %214 = math.tanh %213 : vector<8x32xf32>
    %215 = arith.mulf %210, %214 : vector<8x32xf32>
    %c48 = arith.constant 48 : index
    %c0_49 = arith.constant 0 : index
    %216 = vector.load %arg11[%c48, %c0_49] : memref<64x32xf32, #tpu.memory_space<vmem>>, vector<8x32xf32>
    tpu.vector_store %arg11[%c48, %c0_49], %215 {strides = array<i32>} : memref<64x32xf32, #tpu.memory_space<vmem>>, vector<8x32xf32>,
    %217 = vector.extract_strided_slice %9 {offsets = [56, 0], sizes = [8, 128], strides = [1, 1]} : vector<64x128xf32> to vector<8x128xf32>
    %cst_50 = arith.constant dense<0.000000e+00> : vector<8x128xf32>
    %218 = tpu.matmul %215, %4, %cst_50 {dimension_numbers = #tpu.dot_dimension_numbers<[1], [0], [0], [1], [0, 0, 1, 1], [], []>} : vector<8x32xf32>, vector<32x128xf32>, vector<8x128xf32> -> vector<8x128xf32>
    %219 = arith.addf %217, %218 : vector<8x128xf32>
    %220 = vector.extract_strided_slice %219 {offsets = [0, 0], sizes = [8, 32], strides = [1, 1]} : vector<8x128xf32> to vector<8x32xf32>
    %221 = arith.negf %220 : vector<8x32xf32>
    %222 = math.exp %221 : vector<8x32xf32>
    %cst_51 = arith.constant 1.000000e+00 : f32
    %223 = vector.broadcast %cst_51 : f32 to vector<8x32xf32>
    %224 = arith.addf %223, %222 : vector<8x32xf32>
    %225 = arith.divf %223, %224 : vector<8x32xf32>
    %226 = vector.extract_strided_slice %219 {offsets = [0, 32], sizes = [8, 32], strides = [1, 1]} : vector<8x128xf32> to vector<8x32xf32>
    %227 = arith.negf %226 : vector<8x32xf32>
    %228 = math.exp %227 : vector<8x32xf32>
    %cst_52 = arith.constant 1.000000e+00 : f32
    %229 = vector.broadcast %cst_52 : f32 to vector<8x32xf32>
    %230 = arith.addf %229, %228 : vector<8x32xf32>
    %231 = arith.divf %229, %230 : vector<8x32xf32>
    %232 = vector.extract_strided_slice %219 {offsets = [0, 64], sizes = [8, 32], strides = [1, 1]} : vector<8x128xf32> to vector<8x32xf32>
    %233 = math.tanh %232 : vector<8x32xf32>
    %234 = vector.extract_strided_slice %219 {offsets = [0, 96], sizes = [8, 32], strides = [1, 1]} : vector<8x128xf32> to vector<8x32xf32>
    %235 = arith.negf %234 : vector<8x32xf32>
    %236 = math.exp %235 : vector<8x32xf32>
    %cst_53 = arith.constant 1.000000e+00 : f32
    %237 = vector.broadcast %cst_53 : f32 to vector<8x32xf32>
    %238 = arith.addf %237, %236 : vector<8x32xf32>
    %239 = arith.divf %237, %238 : vector<8x32xf32>
    %240 = arith.mulf %231, %213 : vector<8x32xf32>
    %241 = arith.mulf %225, %233 : vector<8x32xf32>
    %242 = arith.addf %240, %241 : vector<8x32xf32>
    %243 = math.tanh %242 : vector<8x32xf32>
    %244 = arith.mulf %239, %243 : vector<8x32xf32>
    %c56 = arith.constant 56 : index
    %c0_54 = arith.constant 0 : index
    %245 = vector.load %arg11[%c56, %c0_54] : memref<64x32xf32, #tpu.memory_space<vmem>>, vector<8x32xf32>
    tpu.vector_store %arg11[%c56, %c0_54], %244 {strides = array<i32>} : memref<64x32xf32, #tpu.memory_space<vmem>>, vector<8x32xf32>,
    %c0_55 = arith.constant 0 : index
    %c0_56 = arith.constant 0 : index
    %c0_57 = arith.constant 0 : index
    %246 = vector.load %arg12[%c0_55, %c0_56, %c0_57] : memref<2x8x32xf32, #tpu.memory_space<vmem>>, vector<1x8x32xf32>
    %247 = vector.shape_cast %246 : vector<1x8x32xf32> to vector<8x32xf32>
    %248 = vector.shape_cast %244 : vector<8x32xf32> to vector<1x8x32xf32>
    tpu.vector_store %arg12[%c0_55, %c0_56, %c0_57], %248 {strides = array<i32>} : memref<2x8x32xf32, #tpu.memory_space<vmem>>, vector<1x8x32xf32>,
    %c0_58 = arith.constant 0 : index
    %c0_59 = arith.constant 0 : index
    %c0_60 = arith.constant 0 : index
    %249 = vector.load %arg13[%c0_58, %c0_59, %c0_60] : memref<2x8x32xf32, #tpu.memory_space<vmem>>, vector<1x8x32xf32>
    %250 = vector.shape_cast %249 : vector<1x8x32xf32> to vector<8x32xf32>
    %251 = vector.shape_cast %242 : vector<8x32xf32> to vector<1x8x32xf32>
    tpu.vector_store %arg13[%c0_58, %c0_59, %c0_60], %251 {strides = array<i32>} : memref<2x8x32xf32, #tpu.memory_space<vmem>>, vector<1x8x32xf32>,
    %c0_61 = arith.constant 0 : index
    %c0_62 = arith.constant 0 : index
    %252 = vector.load %arg5[%c0_61, %c0_62] : memref<32x128xf32, #tpu.memory_space<vmem>>, vector<32x128xf32>
    %c0_63 = arith.constant 0 : index
    %c0_64 = arith.constant 0 : index
    %253 = vector.load %arg6[%c0_63, %c0_64] : memref<32x128xf32, #tpu.memory_space<vmem>>, vector<32x128xf32>
    %c0_65 = arith.constant 0 : index
    %c0_66 = arith.constant 0 : index
    %254 = vector.load %arg7[%c0_65, %c0_66] : memref<1x128xf32, #tpu.memory_space<vmem>>, vector<1x128xf32>
    %c0_67 = arith.constant 0 : index
    %c0_68 = arith.constant 0 : index
    %255 = vector.load %arg11[%c0_67, %c0_68] : memref<64x32xf32, #tpu.memory_space<vmem>>, vector<64x32xf32>
    %cst_69 = arith.constant dense<0.000000e+00> : vector<64x128xf32>
    %256 = tpu.matmul %255, %252, %cst_69 {dimension_numbers = #tpu.dot_dimension_numbers<[1], [0], [0], [1], [0, 0, 1, 1], [], []>} : vector<64x32xf32>, vector<32x128xf32>, vector<64x128xf32> -> vector<64x128xf32>
    %257 = vector.broadcast %254 : vector<1x128xf32> to vector<64x128xf32>
    %258 = arith.addf %256, %257 : vector<64x128xf32>
    %c1 = arith.constant 1 : index
    %c0_70 = arith.constant 0 : index
    %c0_71 = arith.constant 0 : index
    %259 = vector.load %arg12[%c1, %c0_70, %c0_71] : memref<2x8x32xf32, #tpu.memory_space<vmem>>, vector<1x8x32xf32>
    %260 = vector.shape_cast %259 : vector<1x8x32xf32> to vector<8x32xf32>
    %c1_72 = arith.constant 1 : index
    %c0_73 = arith.constant 0 : index
    %c0_74 = arith.constant 0 : index
    %261 = vector.load %arg13[%c1_72, %c0_73, %c0_74] : memref<2x8x32xf32, #tpu.memory_space<vmem>>, vector<1x8x32xf32>
    %262 = vector.shape_cast %261 : vector<1x8x32xf32> to vector<8x32xf32>
    %263 = vector.extract_strided_slice %258 {offsets = [0, 0], sizes = [8, 128], strides = [1, 1]} : vector<64x128xf32> to vector<8x128xf32>
    %cst_75 = arith.constant dense<0.000000e+00> : vector<8x128xf32>
    %264 = tpu.matmul %260, %253, %cst_75 {dimension_numbers = #tpu.dot_dimension_numbers<[1], [0], [0], [1], [0, 0, 1, 1], [], []>} : vector<8x32xf32>, vector<32x128xf32>, vector<8x128xf32> -> vector<8x128xf32>
    %265 = arith.addf %263, %264 : vector<8x128xf32>
    %266 = vector.extract_strided_slice %265 {offsets = [0, 0], sizes = [8, 32], strides = [1, 1]} : vector<8x128xf32> to vector<8x32xf32>
    %267 = arith.negf %266 : vector<8x32xf32>
    %268 = math.exp %267 : vector<8x32xf32>
    %cst_76 = arith.constant 1.000000e+00 : f32
    %269 = vector.broadcast %cst_76 : f32 to vector<8x32xf32>
    %270 = arith.addf %269, %268 : vector<8x32xf32>
    %271 = arith.divf %269, %270 : vector<8x32xf32>
    %272 = vector.extract_strided_slice %265 {offsets = [0, 32], sizes = [8, 32], strides = [1, 1]} : vector<8x128xf32> to vector<8x32xf32>
    %273 = arith.negf %272 : vector<8x32xf32>
    %274 = math.exp %273 : vector<8x32xf32>
    %cst_77 = arith.constant 1.000000e+00 : f32
    %275 = vector.broadcast %cst_77 : f32 to vector<8x32xf32>
    %276 = arith.addf %275, %274 : vector<8x32xf32>
    %277 = arith.divf %275, %276 : vector<8x32xf32>
    %278 = vector.extract_strided_slice %265 {offsets = [0, 64], sizes = [8, 32], strides = [1, 1]} : vector<8x128xf32> to vector<8x32xf32>
    %279 = math.tanh %278 : vector<8x32xf32>
    %280 = vector.extract_strided_slice %265 {offsets = [0, 96], sizes = [8, 32], strides = [1, 1]} : vector<8x128xf32> to vector<8x32xf32>
    %281 = arith.negf %280 : vector<8x32xf32>
    %282 = math.exp %281 : vector<8x32xf32>
    %cst_78 = arith.constant 1.000000e+00 : f32
    %283 = vector.broadcast %cst_78 : f32 to vector<8x32xf32>
    %284 = arith.addf %283, %282 : vector<8x32xf32>
    %285 = arith.divf %283, %284 : vector<8x32xf32>
    %286 = arith.mulf %277, %262 : vector<8x32xf32>
    %287 = arith.mulf %271, %279 : vector<8x32xf32>
    %288 = arith.addf %286, %287 : vector<8x32xf32>
    %289 = math.tanh %288 : vector<8x32xf32>
    %290 = arith.mulf %285, %289 : vector<8x32xf32>
    %c0_79 = arith.constant 0 : index
    %c0_80 = arith.constant 0 : index
    %291 = vector.load %arg8[%c0_79, %c0_80] : memref<64x32xf32, #tpu.memory_space<vmem>>, vector<8x32xf32>
    tpu.vector_store %arg8[%c0_79, %c0_80], %290 {strides = array<i32>} : memref<64x32xf32, #tpu.memory_space<vmem>>, vector<8x32xf32>,
    %292 = vector.extract_strided_slice %258 {offsets = [8, 0], sizes = [8, 128], strides = [1, 1]} : vector<64x128xf32> to vector<8x128xf32>
    %cst_81 = arith.constant dense<0.000000e+00> : vector<8x128xf32>
    %293 = tpu.matmul %290, %253, %cst_81 {dimension_numbers = #tpu.dot_dimension_numbers<[1], [0], [0], [1], [0, 0, 1, 1], [], []>} : vector<8x32xf32>, vector<32x128xf32>, vector<8x128xf32> -> vector<8x128xf32>
    %294 = arith.addf %292, %293 : vector<8x128xf32>
    %295 = vector.extract_strided_slice %294 {offsets = [0, 0], sizes = [8, 32], strides = [1, 1]} : vector<8x128xf32> to vector<8x32xf32>
    %296 = arith.negf %295 : vector<8x32xf32>
    %297 = math.exp %296 : vector<8x32xf32>
    %cst_82 = arith.constant 1.000000e+00 : f32
    %298 = vector.broadcast %cst_82 : f32 to vector<8x32xf32>
    %299 = arith.addf %298, %297 : vector<8x32xf32>
    %300 = arith.divf %298, %299 : vector<8x32xf32>
    %301 = vector.extract_strided_slice %294 {offsets = [0, 32], sizes = [8, 32], strides = [1, 1]} : vector<8x128xf32> to vector<8x32xf32>
    %302 = arith.negf %301 : vector<8x32xf32>
    %303 = math.exp %302 : vector<8x32xf32>
    %cst_83 = arith.constant 1.000000e+00 : f32
    %304 = vector.broadcast %cst_83 : f32 to vector<8x32xf32>
    %305 = arith.addf %304, %303 : vector<8x32xf32>
    %306 = arith.divf %304, %305 : vector<8x32xf32>
    %307 = vector.extract_strided_slice %294 {offsets = [0, 64], sizes = [8, 32], strides = [1, 1]} : vector<8x128xf32> to vector<8x32xf32>
    %308 = math.tanh %307 : vector<8x32xf32>
    %309 = vector.extract_strided_slice %294 {offsets = [0, 96], sizes = [8, 32], strides = [1, 1]} : vector<8x128xf32> to vector<8x32xf32>
    %310 = arith.negf %309 : vector<8x32xf32>
    %311 = math.exp %310 : vector<8x32xf32>
    %cst_84 = arith.constant 1.000000e+00 : f32
    %312 = vector.broadcast %cst_84 : f32 to vector<8x32xf32>
    %313 = arith.addf %312, %311 : vector<8x32xf32>
    %314 = arith.divf %312, %313 : vector<8x32xf32>
    %315 = arith.mulf %306, %288 : vector<8x32xf32>
    %316 = arith.mulf %300, %308 : vector<8x32xf32>
    %317 = arith.addf %315, %316 : vector<8x32xf32>
    %318 = math.tanh %317 : vector<8x32xf32>
    %319 = arith.mulf %314, %318 : vector<8x32xf32>
    %c8_85 = arith.constant 8 : index
    %c0_86 = arith.constant 0 : index
    %320 = vector.load %arg8[%c8_85, %c0_86] : memref<64x32xf32, #tpu.memory_space<vmem>>, vector<8x32xf32>
    tpu.vector_store %arg8[%c8_85, %c0_86], %319 {strides = array<i32>} : memref<64x32xf32, #tpu.memory_space<vmem>>, vector<8x32xf32>,
    %321 = vector.extract_strided_slice %258 {offsets = [16, 0], sizes = [8, 128], strides = [1, 1]} : vector<64x128xf32> to vector<8x128xf32>
    %cst_87 = arith.constant dense<0.000000e+00> : vector<8x128xf32>
    %322 = tpu.matmul %319, %253, %cst_87 {dimension_numbers = #tpu.dot_dimension_numbers<[1], [0], [0], [1], [0, 0, 1, 1], [], []>} : vector<8x32xf32>, vector<32x128xf32>, vector<8x128xf32> -> vector<8x128xf32>
    %323 = arith.addf %321, %322 : vector<8x128xf32>
    %324 = vector.extract_strided_slice %323 {offsets = [0, 0], sizes = [8, 32], strides = [1, 1]} : vector<8x128xf32> to vector<8x32xf32>
    %325 = arith.negf %324 : vector<8x32xf32>
    %326 = math.exp %325 : vector<8x32xf32>
    %cst_88 = arith.constant 1.000000e+00 : f32
    %327 = vector.broadcast %cst_88 : f32 to vector<8x32xf32>
    %328 = arith.addf %327, %326 : vector<8x32xf32>
    %329 = arith.divf %327, %328 : vector<8x32xf32>
    %330 = vector.extract_strided_slice %323 {offsets = [0, 32], sizes = [8, 32], strides = [1, 1]} : vector<8x128xf32> to vector<8x32xf32>
    %331 = arith.negf %330 : vector<8x32xf32>
    %332 = math.exp %331 : vector<8x32xf32>
    %cst_89 = arith.constant 1.000000e+00 : f32
    %333 = vector.broadcast %cst_89 : f32 to vector<8x32xf32>
    %334 = arith.addf %333, %332 : vector<8x32xf32>
    %335 = arith.divf %333, %334 : vector<8x32xf32>
    %336 = vector.extract_strided_slice %323 {offsets = [0, 64], sizes = [8, 32], strides = [1, 1]} : vector<8x128xf32> to vector<8x32xf32>
    %337 = math.tanh %336 : vector<8x32xf32>
    %338 = vector.extract_strided_slice %323 {offsets = [0, 96], sizes = [8, 32], strides = [1, 1]} : vector<8x128xf32> to vector<8x32xf32>
    %339 = arith.negf %338 : vector<8x32xf32>
    %340 = math.exp %339 : vector<8x32xf32>
    %cst_90 = arith.constant 1.000000e+00 : f32
    %341 = vector.broadcast %cst_90 : f32 to vector<8x32xf32>
    %342 = arith.addf %341, %340 : vector<8x32xf32>
    %343 = arith.divf %341, %342 : vector<8x32xf32>
    %344 = arith.mulf %335, %317 : vector<8x32xf32>
    %345 = arith.mulf %329, %337 : vector<8x32xf32>
    %346 = arith.addf %344, %345 : vector<8x32xf32>
    %347 = math.tanh %346 : vector<8x32xf32>
    %348 = arith.mulf %343, %347 : vector<8x32xf32>
    %c16_91 = arith.constant 16 : index
    %c0_92 = arith.constant 0 : index
    %349 = vector.load %arg8[%c16_91, %c0_92] : memref<64x32xf32, #tpu.memory_space<vmem>>, vector<8x32xf32>
    tpu.vector_store %arg8[%c16_91, %c0_92], %348 {strides = array<i32>} : memref<64x32xf32, #tpu.memory_space<vmem>>, vector<8x32xf32>,
    %350 = vector.extract_strided_slice %258 {offsets = [24, 0], sizes = [8, 128], strides = [1, 1]} : vector<64x128xf32> to vector<8x128xf32>
    %cst_93 = arith.constant dense<0.000000e+00> : vector<8x128xf32>
    %351 = tpu.matmul %348, %253, %cst_93 {dimension_numbers = #tpu.dot_dimension_numbers<[1], [0], [0], [1], [0, 0, 1, 1], [], []>} : vector<8x32xf32>, vector<32x128xf32>, vector<8x128xf32> -> vector<8x128xf32>
    %352 = arith.addf %350, %351 : vector<8x128xf32>
    %353 = vector.extract_strided_slice %352 {offsets = [0, 0], sizes = [8, 32], strides = [1, 1]} : vector<8x128xf32> to vector<8x32xf32>
    %354 = arith.negf %353 : vector<8x32xf32>
    %355 = math.exp %354 : vector<8x32xf32>
    %cst_94 = arith.constant 1.000000e+00 : f32
    %356 = vector.broadcast %cst_94 : f32 to vector<8x32xf32>
    %357 = arith.addf %356, %355 : vector<8x32xf32>
    %358 = arith.divf %356, %357 : vector<8x32xf32>
    %359 = vector.extract_strided_slice %352 {offsets = [0, 32], sizes = [8, 32], strides = [1, 1]} : vector<8x128xf32> to vector<8x32xf32>
    %360 = arith.negf %359 : vector<8x32xf32>
    %361 = math.exp %360 : vector<8x32xf32>
    %cst_95 = arith.constant 1.000000e+00 : f32
    %362 = vector.broadcast %cst_95 : f32 to vector<8x32xf32>
    %363 = arith.addf %362, %361 : vector<8x32xf32>
    %364 = arith.divf %362, %363 : vector<8x32xf32>
    %365 = vector.extract_strided_slice %352 {offsets = [0, 64], sizes = [8, 32], strides = [1, 1]} : vector<8x128xf32> to vector<8x32xf32>
    %366 = math.tanh %365 : vector<8x32xf32>
    %367 = vector.extract_strided_slice %352 {offsets = [0, 96], sizes = [8, 32], strides = [1, 1]} : vector<8x128xf32> to vector<8x32xf32>
    %368 = arith.negf %367 : vector<8x32xf32>
    %369 = math.exp %368 : vector<8x32xf32>
    %cst_96 = arith.constant 1.000000e+00 : f32
    %370 = vector.broadcast %cst_96 : f32 to vector<8x32xf32>
    %371 = arith.addf %370, %369 : vector<8x32xf32>
    %372 = arith.divf %370, %371 : vector<8x32xf32>
    %373 = arith.mulf %364, %346 : vector<8x32xf32>
    %374 = arith.mulf %358, %366 : vector<8x32xf32>
    %375 = arith.addf %373, %374 : vector<8x32xf32>
    %376 = math.tanh %375 : vector<8x32xf32>
    %377 = arith.mulf %372, %376 : vector<8x32xf32>
    %c24_97 = arith.constant 24 : index
    %c0_98 = arith.constant 0 : index
    %378 = vector.load %arg8[%c24_97, %c0_98] : memref<64x32xf32, #tpu.memory_space<vmem>>, vector<8x32xf32>
    tpu.vector_store %arg8[%c24_97, %c0_98], %377 {strides = array<i32>} : memref<64x32xf32, #tpu.memory_space<vmem>>, vector<8x32xf32>,
    %379 = vector.extract_strided_slice %258 {offsets = [32, 0], sizes = [8, 128], strides = [1, 1]} : vector<64x128xf32> to vector<8x128xf32>
    %cst_99 = arith.constant dense<0.000000e+00> : vector<8x128xf32>
    %380 = tpu.matmul %377, %253, %cst_99 {dimension_numbers = #tpu.dot_dimension_numbers<[1], [0], [0], [1], [0, 0, 1, 1], [], []>} : vector<8x32xf32>, vector<32x128xf32>, vector<8x128xf32> -> vector<8x128xf32>
    %381 = arith.addf %379, %380 : vector<8x128xf32>
    %382 = vector.extract_strided_slice %381 {offsets = [0, 0], sizes = [8, 32], strides = [1, 1]} : vector<8x128xf32> to vector<8x32xf32>
    %383 = arith.negf %382 : vector<8x32xf32>
    %384 = math.exp %383 : vector<8x32xf32>
    %cst_100 = arith.constant 1.000000e+00 : f32
    %385 = vector.broadcast %cst_100 : f32 to vector<8x32xf32>
    %386 = arith.addf %385, %384 : vector<8x32xf32>
    %387 = arith.divf %385, %386 : vector<8x32xf32>
    %388 = vector.extract_strided_slice %381 {offsets = [0, 32], sizes = [8, 32], strides = [1, 1]} : vector<8x128xf32> to vector<8x32xf32>
    %389 = arith.negf %388 : vector<8x32xf32>
    %390 = math.exp %389 : vector<8x32xf32>
    %cst_101 = arith.constant 1.000000e+00 : f32
    %391 = vector.broadcast %cst_101 : f32 to vector<8x32xf32>
    %392 = arith.addf %391, %390 : vector<8x32xf32>
    %393 = arith.divf %391, %392 : vector<8x32xf32>
    %394 = vector.extract_strided_slice %381 {offsets = [0, 64], sizes = [8, 32], strides = [1, 1]} : vector<8x128xf32> to vector<8x32xf32>
    %395 = math.tanh %394 : vector<8x32xf32>
    %396 = vector.extract_strided_slice %381 {offsets = [0, 96], sizes = [8, 32], strides = [1, 1]} : vector<8x128xf32> to vector<8x32xf32>
    %397 = arith.negf %396 : vector<8x32xf32>
    %398 = math.exp %397 : vector<8x32xf32>
    %cst_102 = arith.constant 1.000000e+00 : f32
    %399 = vector.broadcast %cst_102 : f32 to vector<8x32xf32>
    %400 = arith.addf %399, %398 : vector<8x32xf32>
    %401 = arith.divf %399, %400 : vector<8x32xf32>
    %402 = arith.mulf %393, %375 : vector<8x32xf32>
    %403 = arith.mulf %387, %395 : vector<8x32xf32>
    %404 = arith.addf %402, %403 : vector<8x32xf32>
    %405 = math.tanh %404 : vector<8x32xf32>
    %406 = arith.mulf %401, %405 : vector<8x32xf32>
    %c32_103 = arith.constant 32 : index
    %c0_104 = arith.constant 0 : index
    %407 = vector.load %arg8[%c32_103, %c0_104] : memref<64x32xf32, #tpu.memory_space<vmem>>, vector<8x32xf32>
    tpu.vector_store %arg8[%c32_103, %c0_104], %406 {strides = array<i32>} : memref<64x32xf32, #tpu.memory_space<vmem>>, vector<8x32xf32>,
    %408 = vector.extract_strided_slice %258 {offsets = [40, 0], sizes = [8, 128], strides = [1, 1]} : vector<64x128xf32> to vector<8x128xf32>
    %cst_105 = arith.constant dense<0.000000e+00> : vector<8x128xf32>
    %409 = tpu.matmul %406, %253, %cst_105 {dimension_numbers = #tpu.dot_dimension_numbers<[1], [0], [0], [1], [0, 0, 1, 1], [], []>} : vector<8x32xf32>, vector<32x128xf32>, vector<8x128xf32> -> vector<8x128xf32>
    %410 = arith.addf %408, %409 : vector<8x128xf32>
    %411 = vector.extract_strided_slice %410 {offsets = [0, 0], sizes = [8, 32], strides = [1, 1]} : vector<8x128xf32> to vector<8x32xf32>
    %412 = arith.negf %411 : vector<8x32xf32>
    %413 = math.exp %412 : vector<8x32xf32>
    %cst_106 = arith.constant 1.000000e+00 : f32
    %414 = vector.broadcast %cst_106 : f32 to vector<8x32xf32>
    %415 = arith.addf %414, %413 : vector<8x32xf32>
    %416 = arith.divf %414, %415 : vector<8x32xf32>
    %417 = vector.extract_strided_slice %410 {offsets = [0, 32], sizes = [8, 32], strides = [1, 1]} : vector<8x128xf32> to vector<8x32xf32>
    %418 = arith.negf %417 : vector<8x32xf32>
    %419 = math.exp %418 : vector<8x32xf32>
    %cst_107 = arith.constant 1.000000e+00 : f32
    %420 = vector.broadcast %cst_107 : f32 to vector<8x32xf32>
    %421 = arith.addf %420, %419 : vector<8x32xf32>
    %422 = arith.divf %420, %421 : vector<8x32xf32>
    %423 = vector.extract_strided_slice %410 {offsets = [0, 64], sizes = [8, 32], strides = [1, 1]} : vector<8x128xf32> to vector<8x32xf32>
    %424 = math.tanh %423 : vector<8x32xf32>
    %425 = vector.extract_strided_slice %410 {offsets = [0, 96], sizes = [8, 32], strides = [1, 1]} : vector<8x128xf32> to vector<8x32xf32>
    %426 = arith.negf %425 : vector<8x32xf32>
    %427 = math.exp %426 : vector<8x32xf32>
    %cst_108 = arith.constant 1.000000e+00 : f32
    %428 = vector.broadcast %cst_108 : f32 to vector<8x32xf32>
    %429 = arith.addf %428, %427 : vector<8x32xf32>
    %430 = arith.divf %428, %429 : vector<8x32xf32>
    %431 = arith.mulf %422, %404 : vector<8x32xf32>
    %432 = arith.mulf %416, %424 : vector<8x32xf32>
    %433 = arith.addf %431, %432 : vector<8x32xf32>
    %434 = math.tanh %433 : vector<8x32xf32>
    %435 = arith.mulf %430, %434 : vector<8x32xf32>
    %c40_109 = arith.constant 40 : index
    %c0_110 = arith.constant 0 : index
    %436 = vector.load %arg8[%c40_109, %c0_110] : memref<64x32xf32, #tpu.memory_space<vmem>>, vector<8x32xf32>
    tpu.vector_store %arg8[%c40_109, %c0_110], %435 {strides = array<i32>} : memref<64x32xf32, #tpu.memory_space<vmem>>, vector<8x32xf32>,
    %437 = vector.extract_strided_slice %258 {offsets = [48, 0], sizes = [8, 128], strides = [1, 1]} : vector<64x128xf32> to vector<8x128xf32>
    %cst_111 = arith.constant dense<0.000000e+00> : vector<8x128xf32>
    %438 = tpu.matmul %435, %253, %cst_111 {dimension_numbers = #tpu.dot_dimension_numbers<[1], [0], [0], [1], [0, 0, 1, 1], [], []>} : vector<8x32xf32>, vector<32x128xf32>, vector<8x128xf32> -> vector<8x128xf32>
    %439 = arith.addf %437, %438 : vector<8x128xf32>
    %440 = vector.extract_strided_slice %439 {offsets = [0, 0], sizes = [8, 32], strides = [1, 1]} : vector<8x128xf32> to vector<8x32xf32>
    %441 = arith.negf %440 : vector<8x32xf32>
    %442 = math.exp %441 : vector<8x32xf32>
    %cst_112 = arith.constant 1.000000e+00 : f32
    %443 = vector.broadcast %cst_112 : f32 to vector<8x32xf32>
    %444 = arith.addf %443, %442 : vector<8x32xf32>
    %445 = arith.divf %443, %444 : vector<8x32xf32>
    %446 = vector.extract_strided_slice %439 {offsets = [0, 32], sizes = [8, 32], strides = [1, 1]} : vector<8x128xf32> to vector<8x32xf32>
    %447 = arith.negf %446 : vector<8x32xf32>
    %448 = math.exp %447 : vector<8x32xf32>
    %cst_113 = arith.constant 1.000000e+00 : f32
    %449 = vector.broadcast %cst_113 : f32 to vector<8x32xf32>
    %450 = arith.addf %449, %448 : vector<8x32xf32>
    %451 = arith.divf %449, %450 : vector<8x32xf32>
    %452 = vector.extract_strided_slice %439 {offsets = [0, 64], sizes = [8, 32], strides = [1, 1]} : vector<8x128xf32> to vector<8x32xf32>
    %453 = math.tanh %452 : vector<8x32xf32>
    %454 = vector.extract_strided_slice %439 {offsets = [0, 96], sizes = [8, 32], strides = [1, 1]} : vector<8x128xf32> to vector<8x32xf32>
    %455 = arith.negf %454 : vector<8x32xf32>
    %456 = math.exp %455 : vector<8x32xf32>
    %cst_114 = arith.constant 1.000000e+00 : f32
    %457 = vector.broadcast %cst_114 : f32 to vector<8x32xf32>
    %458 = arith.addf %457, %456 : vector<8x32xf32>
    %459 = arith.divf %457, %458 : vector<8x32xf32>
    %460 = arith.mulf %451, %433 : vector<8x32xf32>
    %461 = arith.mulf %445, %453 : vector<8x32xf32>
    %462 = arith.addf %460, %461 : vector<8x32xf32>
    %463 = math.tanh %462 : vector<8x32xf32>
    %464 = arith.mulf %459, %463 : vector<8x32xf32>
    %c48_115 = arith.constant 48 : index
    %c0_116 = arith.constant 0 : index
    %465 = vector.load %arg8[%c48_115, %c0_116] : memref<64x32xf32, #tpu.memory_space<vmem>>, vector<8x32xf32>
    tpu.vector_store %arg8[%c48_115, %c0_116], %464 {strides = array<i32>} : memref<64x32xf32, #tpu.memory_space<vmem>>, vector<8x32xf32>,
    %466 = vector.extract_strided_slice %258 {offsets = [56, 0], sizes = [8, 128], strides = [1, 1]} : vector<64x128xf32> to vector<8x128xf32>
    %cst_117 = arith.constant dense<0.000000e+00> : vector<8x128xf32>
    %467 = tpu.matmul %464, %253, %cst_117 {dimension_numbers = #tpu.dot_dimension_numbers<[1], [0], [0], [1], [0, 0, 1, 1], [], []>} : vector<8x32xf32>, vector<32x128xf32>, vector<8x128xf32> -> vector<8x128xf32>
    %468 = arith.addf %466, %467 : vector<8x128xf32>
    %469 = vector.extract_strided_slice %468 {offsets = [0, 0], sizes = [8, 32], strides = [1, 1]} : vector<8x128xf32> to vector<8x32xf32>
    %470 = arith.negf %469 : vector<8x32xf32>
    %471 = math.exp %470 : vector<8x32xf32>
    %cst_118 = arith.constant 1.000000e+00 : f32
    %472 = vector.broadcast %cst_118 : f32 to vector<8x32xf32>
    %473 = arith.addf %472, %471 : vector<8x32xf32>
    %474 = arith.divf %472, %473 : vector<8x32xf32>
    %475 = vector.extract_strided_slice %468 {offsets = [0, 32], sizes = [8, 32], strides = [1, 1]} : vector<8x128xf32> to vector<8x32xf32>
    %476 = arith.negf %475 : vector<8x32xf32>
    %477 = math.exp %476 : vector<8x32xf32>
    %cst_119 = arith.constant 1.000000e+00 : f32
    %478 = vector.broadcast %cst_119 : f32 to vector<8x32xf32>
    %479 = arith.addf %478, %477 : vector<8x32xf32>
    %480 = arith.divf %478, %479 : vector<8x32xf32>
    %481 = vector.extract_strided_slice %468 {offsets = [0, 64], sizes = [8, 32], strides = [1, 1]} : vector<8x128xf32> to vector<8x32xf32>
    %482 = math.tanh %481 : vector<8x32xf32>
    %483 = vector.extract_strided_slice %468 {offsets = [0, 96], sizes = [8, 32], strides = [1, 1]} : vector<8x128xf32> to vector<8x32xf32>
    %484 = arith.negf %483 : vector<8x32xf32>
    %485 = math.exp %484 : vector<8x32xf32>
    %cst_120 = arith.constant 1.000000e+00 : f32
    %486 = vector.broadcast %cst_120 : f32 to vector<8x32xf32>
    %487 = arith.addf %486, %485 : vector<8x32xf32>
    %488 = arith.divf %486, %487 : vector<8x32xf32>
    %489 = arith.mulf %480, %462 : vector<8x32xf32>
    %490 = arith.mulf %474, %482 : vector<8x32xf32>
    %491 = arith.addf %489, %490 : vector<8x32xf32>
    %492 = math.tanh %491 : vector<8x32xf32>
    %493 = arith.mulf %488, %492 : vector<8x32xf32>
    %c56_121 = arith.constant 56 : index
    %c0_122 = arith.constant 0 : index
    %494 = vector.load %arg8[%c56_121, %c0_122] : memref<64x32xf32, #tpu.memory_space<vmem>>, vector<8x32xf32>
    tpu.vector_store %arg8[%c56_121, %c0_122], %493 {strides = array<i32>} : memref<64x32xf32, #tpu.memory_space<vmem>>, vector<8x32xf32>,
    %c1_123 = arith.constant 1 : index
    %c0_124 = arith.constant 0 : index
    %c0_125 = arith.constant 0 : index
    %495 = vector.load %arg12[%c1_123, %c0_124, %c0_125] : memref<2x8x32xf32, #tpu.memory_space<vmem>>, vector<1x8x32xf32>
    %496 = vector.shape_cast %495 : vector<1x8x32xf32> to vector<8x32xf32>
    %497 = vector.shape_cast %493 : vector<8x32xf32> to vector<1x8x32xf32>
    tpu.vector_store %arg12[%c1_123, %c0_124, %c0_125], %497 {strides = array<i32>} : memref<2x8x32xf32, #tpu.memory_space<vmem>>, vector<1x8x32xf32>,
    %c1_126 = arith.constant 1 : index
    %c0_127 = arith.constant 0 : index
    %c0_128 = arith.constant 0 : index
    %498 = vector.load %arg13[%c1_126, %c0_127, %c0_128] : memref<2x8x32xf32, #tpu.memory_space<vmem>>, vector<1x8x32xf32>
    %499 = vector.shape_cast %498 : vector<1x8x32xf32> to vector<8x32xf32>
    %500 = vector.shape_cast %491 : vector<8x32xf32> to vector<1x8x32xf32>
    tpu.vector_store %arg13[%c1_126, %c0_127, %c0_128], %500 {strides = array<i32>} : memref<2x8x32xf32, #tpu.memory_space<vmem>>, vector<1x8x32xf32>,
    %c0_i32_129 = arith.constant 0 : i32
    %501 = arith.cmpi eq, %arg0, %c0_i32_129 : i32
    %502 = arith.extui %501 : i1 to i32
    %c0_i32_130 = arith.constant 0 : i32
    %503 = arith.cmpi ne, %502, %c0_i32_130 : i32
    scf.if %503 {
      %c0_131 = arith.constant 0 : index
      %c0_132 = arith.constant 0 : index
      %c0_133 = arith.constant 0 : index
      %504 = vector.load %arg12[%c0_131, %c0_132, %c0_133] : memref<2x8x32xf32, #tpu.memory_space<vmem>>, vector<2x8x32xf32>
      %c0_134 = arith.constant 0 : index
      %c0_135 = arith.constant 0 : index
      %c0_136 = arith.constant 0 : index
      %505 = vector.load %arg9[%c0_134, %c0_135, %c0_136] : memref<2x8x32xf32, #tpu.memory_space<vmem>>, vector<2x8x32xf32>
      tpu.vector_store %arg9[%c0_134, %c0_135, %c0_136], %504 {strides = array<i32>} : memref<2x8x32xf32, #tpu.memory_space<vmem>>, vector<2x8x32xf32>,
      %c0_137 = arith.constant 0 : index
      %c0_138 = arith.constant 0 : index
      %c0_139 = arith.constant 0 : index
      %506 = vector.load %arg13[%c0_137, %c0_138, %c0_139] : memref<2x8x32xf32, #tpu.memory_space<vmem>>, vector<2x8x32xf32>
      %c0_140 = arith.constant 0 : index
      %c0_141 = arith.constant 0 : index
      %c0_142 = arith.constant 0 : index
      %507 = vector.load %arg10[%c0_140, %c0_141, %c0_142] : memref<2x8x32xf32, #tpu.memory_space<vmem>>, vector<2x8x32xf32>
      tpu.vector_store %arg10[%c0_140, %c0_141, %c0_142], %506 {strides = array<i32>} : memref<2x8x32xf32, #tpu.memory_space<vmem>>, vector<2x8x32xf32>,
    } else {
    }
    return
  }
  func.func @transform_0(%arg0: i32) -> (i32, i32) {
    %c0_i32 = arith.constant 0 : i32
    %c0_i32_0 = arith.constant 0 : i32
    return %arg0, %c0_i32 : i32, i32
  }
  func.func @transform_1(%arg0: i32) -> (i32, i32) {
    %c0_i32 = arith.constant 0 : i32
    %c0_i32_0 = arith.constant 0 : i32
    %c0_i32_1 = arith.constant 0 : i32
    return %c0_i32, %c0_i32_0 : i32, i32
  }
  func.func @transform_2(%arg0: i32) -> (i32, i32) {
    %c0_i32 = arith.constant 0 : i32
    %c0_i32_0 = arith.constant 0 : i32
    %c0_i32_1 = arith.constant 0 : i32
    return %c0_i32, %c0_i32_0 : i32, i32
  }
  func.func @transform_3(%arg0: i32) -> (i32, i32) {
    %c0_i32 = arith.constant 0 : i32
    %c0_i32_0 = arith.constant 0 : i32
    %c0_i32_1 = arith.constant 0 : i32
    return %c0_i32, %c0_i32_0 : i32, i32
  }
  func.func @transform_4(%arg0: i32) -> (i32, i32) {
    %c0_i32 = arith.constant 0 : i32
    %c0_i32_0 = arith.constant 0 : i32
    %c0_i32_1 = arith.constant 0 : i32
    return %c0_i32, %c0_i32_0 : i32, i32
  }
  func.func @transform_5(%arg0: i32) -> (i32, i32) {
    %c0_i32 = arith.constant 0 : i32
    %c0_i32_0 = arith.constant 0 : i32
    %c0_i32_1 = arith.constant 0 : i32
    return %c0_i32, %c0_i32_0 : i32, i32
  }
  func.func @transform_6(%arg0: i32) -> (i32, i32) {
    %c0_i32 = arith.constant 0 : i32
    %c0_i32_0 = arith.constant 0 : i32
    %c0_i32_1 = arith.constant 0 : i32
    return %c0_i32, %c0_i32_0 : i32, i32
  }
  func.func @transform_7(%arg0: i32) -> (i32, i32) {
    %c0_i32 = arith.constant 0 : i32
    %c0_i32_0 = arith.constant 0 : i32
    return %arg0, %c0_i32 : i32, i32
  }
  func.func @transform_8(%arg0: i32) -> (i32, i32, i32) {
    %c0_i32 = arith.constant 0 : i32
    %c0_i32_0 = arith.constant 0 : i32
    %c0_i32_1 = arith.constant 0 : i32
    %c0_i32_2 = arith.constant 0 : i32
    return %c0_i32, %c0_i32_0, %c0_i32_1 : i32, i32, i32
  }
  func.func @transform_9(%arg0: i32) -> (i32, i32, i32) {
    %c0_i32 = arith.constant 0 : i32
    %c0_i32_0 = arith.constant 0 : i32
    %c0_i32_1 = arith.constant 0 : i32
    %c0_i32_2 = arith.constant 0 : i32
    return %c0_i32, %c0_i32_0, %c0_i32_1 : i32, i32, i32
  }
}

</mosaic_0001>

<bundles_post_ra>
// kernel: dkt2_forward.3
= control target key start
LH: loop header
LB: loop body
LE: loop exit
PB: predicated region body
PF: predicated region fallthrough
CT: control target
= control target key end

     0   :  { %vm30_vm0 = vcmask 261120   ;;  %vm122_vm1 = vcmask 7168   ;;  %s219_s1 = inlined_call_operand.vmem [shape: f32[32,32], index: 1, kind: input, shape index: {}]   ;;  %s220_s0 = inlined_call_operand.vmem [shape: f32[16,32], index: 0, kind: input, shape index: {}]   ;;  %s221_s2 = inlined_call_operand.vmem [shape: f32[1,32], index: 2, kind: input, shape index: {}]   ;;  %s222_s3 = inlined_call_operand.vmem [shape: f32[16,32], index: 3, kind: input, shape index: {}]   ;;  %s223_s4 = inlined_call_operand.vmem [shape: f32[16,1], index: 4, kind: output, shape index: {}]  }
   0x1   :  { %v19_v0 = vld [vmem:[%s219_s1] sm:$0xff]  ;;  %v20_v1 = vld [vmem:[%s219_s1 + $0x8] sm:$0xff]  ;;  %v21_v2 = vld [vmem:[%s219_s1 + $0x10] sm:$0xff] }
   0x2   :  { %v149_v3 = vpack.c.bf16 %v20_v1, %v19_v0  ;;  %v22_v4 = vld [vmem:[%s219_s1 + $0x18] sm:$0xff]  ;;  %v17_v5 = vld [vmem:[%s220_s0] sm:$0xff]  ;;  %v18_v7 = vld [vmem:[%s220_s0 + $0x8] sm:$0xff] }
   0x3   :  { %v153_v6 = vpack.c.bf16 %v22_v4, %v21_v2  ;;  %146 = vmatprep.mubr.msk.f32.mxu0 %vm30_vm0, %v17_v5  ;;  %v129_v8 = vld [vmem:[%s221_s2] ss:$0 sm:$0xff]  ;;  %v113_v14 = vld [vmem:[%s222_s3 + $0x8] sm:$0xff] }
   0x4   :  { %150 = vmatprep.subr.bf16.mxu0 %v149_v3  ;;  %v112_v11 = vld [vmem:[%s222_s3] sm:$0xff] }
   0x5   :  { %152 = vmatpush3.bf16.msra.mxu0 %v149_v3 }
   0x6   :  { %154 = vmatprep.subr.bf16.mxu0 %v153_v6 }
   0x9   :  { %156 = vmatpush3.bf16.msra.mxu0 %v153_v6 }
   0xc   :  { %147 = vmatmul.mubr.msk.f32.vlgmr.msra.gmra.mrb[0].mxu0 %vm30_vm0, %v18_v7 }
  0xdf   :  { %v148_v9 = vpop.f32.mrb[0].mxu0 }
  0xe0   :  { %v103_v10 = vpop.f32.mrb[1].mxu0  ;;  %v109_v12 = vadd.f32 %v148_v9, %v129_v8 }
  0xe1   :  { %v104_v13 = vadd.f32 %v129_v8, %v103_v10 }
  0xe2   :  { %v115_v17 = vmul.f32 %v113_v14, %v109_v12 }
  0xe3   :  { %v114_v15 = vmul.f32 %v112_v11, %v104_v13 }
  0xe4   :  { %v119_v18 = vsel %vm30_vm0, %v115_v17, 0.0 }
  0xe5   :  { %v116_v16 = vsel %vm30_vm0, %v114_v15, 0.0 }
  0xe6   :  { %117 = vadd.xlane.f32.xlu0 %v116_v16 }
  0xea   :  { %120 = vadd.xlane.f32.xlu0 %v119_v18 }
 0x173   :  { %v118_v19 = vpop.xlane.xlu0 %117 }
 0x174   :  { %123 = vst.msk [vmem:[%s223_s4] sm:$0xff] %vm122_vm1, %v118_v19 }
 0x177   :  { %v121_v20 = vpop.xlane.xlu0 %120 }
 0x178   :  { %124 = vst.msk [vmem:[%s223_s4 + $0x8] sm:$0xff] %vm122_vm1, %v121_v20 }

// kernel: dkt2_forward.2
= control target key start
LH: loop header
LB: loop body
LE: loop exit
PB: predicated region body
PF: predicated region fallthrough
CT: control target
= control target key end

     0   :  { %v2667_v3 = vmov 0.0|0.0   ;;  %vm2668_vm0 = vmmov 0   ;;  %v2669_v4 = vmov 0.0   ;;  %vm33_vm1 = vcmask 261120   ;;  %s2670_s16 = smov 64   ;;  %s2671_s17 = smov 32   ;;  %s3141_s1 = inlined_call_operand.vmem [shape: f32[64,128], index: 1, kind: input, shape index: {}]   ;;  %s3142_s2 = inlined_call_operand.vmem [shape: f32[32,128], index: 2, kind: input, shape index: {}]   ;;  %s3143_s0 = inlined_call_operand.vmem [shape: f32[64,64], index: 0, kind: input, shape index: {}]   ;;  %s3144_s3 = inlined_call_operand.vmem [shape: f32[1,128], index: 3, kind: input, shape index: {}]   ;;  %s3145_s4 = inlined_call_operand.vmem [shape: f32[32,128], index: 4, kind: input, shape index: {}]   ;;  %s3146_s5 = inlined_call_operand.vmem [shape: f32[32,128], index: 5, kind: input, shape index: {}]   ;;  %s3147_s6 = inlined_call_operand.vmem [shape: f32[1,128], index: 6, kind: input, shape index: {}]   ;;  %s3148_s7 = inlined_call_operand.vmem [shape: f32[64,32], index: 7, kind: output, shape index: {0}]   ;;  %s3149_s8 = inlined_call_operand.vmem [shape: f32[2,8,32], index: 8, kind: output, shape index: {1}]   ;;  %s3150_s9 = inlined_call_operand.vmem [shape: f32[2,8,32], index: 9, kind: output, shape index: {2}]  }
   0x1   :  { %v38_v0 = vld [vmem:[%s3141_s1] sm:$0xff]  ;;  %v39_v1 = vld [vmem:[%s3141_s1 + $0x8] sm:$0xff]  ;;  %v40_v2 = vld [vmem:[%s3141_s1 + $0x10] sm:$0xff]  ;;  %2429 = vmatprep.subr.bf16.mxu1 %v2667_v3  ;;  %2225 = vmatprep.mubr.msk.f32.mxu1 %vm2668_vm0, %v2669_v4  ;;  %vm65_vm2 = vcmask 523264   ;;  %34 = vst.msk [vmem:[#allocation3] sm:$0xff] %vm33_vm1, %v2669_v4 }
   0x2   :  { %v2413_v5 = vpack.c.bf16 %v39_v1, %v38_v0  ;;  %v41_v6 = vld [vmem:[%s3141_s1 + $0x18] sm:$0xff]  ;;  %v42_v7 = vld [vmem:[%s3141_s1 + $0x20] sm:$0xff]  ;;  %35 = vst.msk [vmem:[#allocation3 + $0x8] sm:$0xff] %vm33_vm1, %v2669_v4  ;;  %36 = vst.msk [vmem:[#allocation4] sm:$0xff] %vm33_vm1, %v2669_v4 }
   0x3   :  { %37 = vst.msk [vmem:[#allocation4 + $0x8] sm:$0xff] %vm33_vm1, %v2669_v4  ;;  %v2417_v8 = vpack.c.bf16 %v41_v6, %v40_v2  ;;  %v43_v9 = vld [vmem:[%s3141_s1 + $0x28] sm:$0xff]  ;;  %v46_v10 = vld [vmem:[%s3142_s2] sm:$0xff]  ;;  %v48_v14 = vld [vmem:[%s3142_s2 + $0x10] sm:$0xff] }
   0x4   :  { %v47_v11 = vld [vmem:[%s3142_s2 + $0x8] sm:$0xff]  ;;  %2414 = vmatprep.subr.bf16.mxu0 %v2413_v5  ;;  %v51_v13 = vld [vmem:[%s3143_s0] sm:$0xff]  ;;  %v49_v15 = vld [vmem:[%s3142_s2 + $0x18] sm:$0xff]  ;;  %v2421_v16 = vpack.c.bf16 %v43_v9, %v42_v7 }
   0x5   :  { %v2758_v12 = vpack.c.bf16 %v47_v11, %v46_v10  ;;  %2416 = vmatpush3.bf16.msra.mxu0 %v2413_v5  ;;  %2205 = vmatprep.mubr.msk.f32.mxu0 %vm65_vm2, %v51_v13  ;;  %v2771_v17 = vpack.c.bf16 %v49_v15, %v48_v14  ;;  %v44_v18 = vld [vmem:[%s3141_s1 + $0x30] sm:$0xff]  ;;  %v45_v19 = vld [vmem:[%s3141_s1 + $0x38] sm:$0xff]  ;;  %v52_v22 = vld [vmem:[%s3143_s0 + $0x8] sm:$0xff] }
   0x6   :  { %2418 = vmatprep.subr.bf16.mxu0 %v2417_v8  ;;  %v2425_v20 = vpack.c.bf16 %v45_v19, %v44_v18  ;;  %v2801_v25 = vld [vmem:[%s3144_s3] ss:$0 sm:$0xff]  ;;  %v53_v60 = vld [vmem:[%s3143_s0 + $0x10] sm:$0xff]  ;;  %v54_v61 = vld [vmem:[%s3143_s0 + $0x18] sm:$0xff] }
   0x7   :  { %2431 = vmatpush3.bf16.msra.mxu1 %v2758_v12 }
   0x8   :  { %2432 = vmatprep.subr.bf16.mxu1 %v2667_v3  ;;  %v195_v21 = vld [vmem:[#allocation3] sm:$0xff] }
   0x9   :  { %2420 = vmatpush3.bf16.msra.mxu0 %v2417_v8  ;;  %v196_v31 = vld [vmem:[#allocation4] sm:$0xff] }
   0xa   :  { %2422 = vmatprep.subr.bf16.mxu0 %v2421_v16 }
   0xb   :  { %2434 = vmatpush3.bf16.msra.mxu1 %v2771_v17 }
   0xc   :  { %2435 = vmatprep.subr.bf16.mxu1 %v2667_v3 }
   0xd   :  { %2424 = vmatpush3.bf16.msra.mxu0 %v2421_v16 }
   0xe   :  { %2226 = vmatmul.mubr.msk.f32.vlgmr.msra.gmra.mrb[0].mxu1 %vm33_vm1, %v195_v21  ;;  %2426 = vmatprep.subr.bf16.mxu0 %v2425_v20 }
   0xf   :  { %2437 = vmatpush3.bf16.msra.mxu1 %v2758_v12  ;;  %2236 = vmatprep.mubr.msk.f32.mxu1 %vm2668_vm0, %v2669_v4 }
  0x10   :  { %2438 = vmatprep.subr.bf16.mxu1 %v2667_v3 }
  0x11   :  { %2428 = vmatpush3.bf16.msra.mxu0 %v2425_v20 }
  0x12   :  { %2447 = vmatprep.subr.bf16.mxu0 %v2667_v3 }
  0x13   :  { %2440 = vmatpush3.bf16.msra.mxu1 %v2771_v17 }
  0x14   :  { %2441 = vmatprep.subr.bf16.mxu1 %v2667_v3  ;;  %2206 = vmatmul.mubr.msk.f32.vlgmr.msra.gmra.mrb[0].mxu0 %vm65_vm2, %v52_v22  ;;  %v55_v22 = vld [vmem:[%s3143_s0 + $0x20] sm:$0xff] }
  0x15   :  { %2449 = vmatpush3.bf16.msra.mxu0 %v2758_v12  ;;  %2208 = vmatprep.mubr.msk.f32.mxu0 %vm65_vm2, %v53_v60 }
  0x16   :  { %2450 = vmatprep.subr.bf16.mxu0 %v2667_v3 }
  0x18   :  { %2209 = vmatmul.mubr.msk.f32.gmra.mrb[2].mxu0 %vm65_vm2, %v54_v61 }
  0x19   :  { %2452 = vmatpush3.bf16.msra.mxu0 %v2771_v17  ;;  %2211 = vmatprep.mubr.msk.f32.mxu0 %vm65_vm2, %v55_v22 }
  0x1a   :  { %2459 = vmatprep.subr.bf16.mxu0 %v2667_v3 }
  0xe1   :  { %v267_v23 = vpop.f32.mrb[0].mxu1 }
  0xe2   :  { %v2227_v24 = vpop.f32.mrb[1].mxu1 }
  0xe3   :  { %v57_v24 = vld [vmem:[%s3143_s0 + $0x30] sm:$0xff] }
  0xe7   :  { %v2207_v26 = vpop.f32.mrb[0].mxu0 }
  0xe8   :  { %v156_v27 = vpop.f32.mrb[1].mxu0  ;;  %v162_v46 = vadd.f32 %v2207_v26, %v2801_v25  ;;  %v58_v26 = vld [vmem:[%s3143_s0 + $0x38] sm:$0xff] }
  0xe9   :  { %v157_v28 = vadd.f32 %v2801_v25, %v156_v27 }
  0xeb   :  { %v271_v29 = vadd.f32 %v267_v23, %v157_v28  ;;  %v2210_v1 = vpop.f32.mrb[2].mxu0  ;;  %v56_v23 = vld [vmem:[%s3143_s0 + $0x28] sm:$0xff] }
  0xec   :  { %v166_v2 = vpop.f32.mrb[3].mxu0  ;;  %2212 = vmatmul.mubr.msk.f32.gmra.mrb[4].mxu0 %vm65_vm2, %v56_v23  ;;  %v1025_v23 = vld [vmem:[%s3145_s4] sm:$0xff] }
  0xed   :  { %2539 = vtanh.f32 %v271_v29  ;;  %v2041_v32 = vmul.f32 -1.442695, %v271_v29  ;;  %v167_v6 = vadd.f32 %v2801_v25, %v166_v2  ;;  %2214 = vmatprep.mubr.msk.f32.mxu0 %vm65_vm2, %v57_v24  ;;  %v1026_v24 = vld [vmem:[%s3145_s4 + $0x8] sm:$0xff] }
  0xef   :  { %2541 = vpow2.f32 %v2041_v32 }
  0xf0   :  { %2215 = vmatmul.mubr.msk.f32.gmra.mrb[6].mxu0 %vm65_vm2, %v58_v26  ;;  %v2477_v26 = vpack.c.bf16 %v1026_v24, %v1025_v23 }
  0xf1   :  { %2258 = vmatprep.mubr.msk.f32.mxu0 %vm2668_vm0, %v2669_v4 }
  0xf7   :  { %v2540_v30 = vpop.eup %2539 }
  0xf8   :  { %285 = vrot.lane.b32.xlu0 %v2540_v30, %s2670_s16 }
  0xf9   :  { %v2542_v33 = vpop.eup %2541 }
  0xfa   :  { %v275_v34 = vadd.f32 1.0, %v2542_v33 }
  0xfc   :  { %280 = vrot.lane.b32.xlu0 %v196_v31, %s2671_s17  ;;  %2543 = vrcp.f32 %v275_v34 }
 0x106   :  { %v2544_v35 = vpop.eup %2543 }
 0x16a   :  { %v286_v36 = vpop.permute.xlu0 %285 }
 0x16b   :  { %v288_v37 = vmul.f32 %v2544_v35, %v286_v36 }
 0x16d   :  { %290 = vrot.lane.b32.xlu1 %v288_v37, %s2671_s17 }
 0x16e   :  { %v281_v38 = vpop.permute.xlu0 %280 }
 0x16f   :  { %v283_v39 = vmul.f32 %v2544_v35, %v281_v38 }
 0x1bf   :  { %v2861_v30 = vpop.f32.mrb[4].mxu0 }
 0x1c0   :  { %v176_v31 = vpop.f32.mrb[5].mxu0 }
 0x1c3   :  { %v2863_v32 = vpop.f32.mrb[6].mxu0 }
 0x1c4   :  { %v2865_v33 = vpop.f32.mrb[7].mxu0 }
 0x1df   :  { %v291_v40 = vpop.permute.xlu1 %290 }
 0x1e0   :  { %v293_v41 = vadd.f32 %v291_v40, %v283_v39 }
 0x1e2   :  { %2545 = vtanh.f32 %v293_v41 }
 0x1ec   :  { %v2546_v42 = vpop.eup %2545 }
 0x1ed   :  { %296 = vrot.lane.b32.xlu1 %v2546_v42, %s2670_s16 }
 0x25f   :  { %v297_v43 = vpop.permute.xlu1 %296 }
 0x260   :  { %v299_v44 = vmul.f32 %v2544_v35, %v297_v43  ;;  %v172_v35 = vadd.f32 %v2210_v1, %v2801_v25 }
 0x262   :  { %301 = vrot.lane.b32.xlu0 %v299_v44, %s2671_s17 }
 0x2d4   :  { %v302_v45 = vpop.permute.xlu0 %301 }
 0x2d5   :  { %304 = vst.msk [vmem:[#allocation2] sm:$0xff] %vm33_vm1, %v302_v45  ;;  %2237 = vmatmul.mubr.msk.f32.vlgmr.msra.gmra.mrb[2].mxu1 %vm33_vm1, %v302_v45 }
 0x2d6   :  { %2443 = vmatpush3.bf16.msra.mxu1 %v2758_v12  ;;  %2247 = vmatprep.mubr.msk.f32.mxu1 %vm2668_vm0, %v2669_v4 }
 0x2d7   :  { %2444 = vmatprep.subr.bf16.mxu1 %v2667_v3 }
 0x2da   :  { %2446 = vmatpush3.bf16.msra.mxu1 %v2771_v17 }
 0x2db   :  { %2453 = vmatprep.subr.bf16.mxu1 %v2667_v3 }
 0x3a8   :  { %v373_v47 = vpop.f32.mrb[2].mxu1 }
 0x3a9   :  { %v377_v48 = vadd.f32 %v373_v47, %v162_v46  ;;  %v2238_v49 = vpop.f32.mrb[3].mxu1 }
 0x3ab   :  { %2547 = vtanh.f32 %v377_v48  ;;  %v2043_v51 = vmul.f32 -1.442695, %v377_v48 }
 0x3ad   :  { %2549 = vpow2.f32 %v2043_v51 }
 0x3b5   :  { %v2548_v50 = vpop.eup %2547 }
 0x3b6   :  { %387 = vrot.lane.b32.xlu1 %v2548_v50, %s2670_s16 }
 0x3b7   :  { %v2550_v52 = vpop.eup %2549 }
 0x3b8   :  { %v381_v53 = vadd.f32 1.0, %v2550_v52 }
 0x3ba   :  { %2551 = vrcp.f32 %v381_v53  ;;  %v177_v53 = vadd.f32 %v2801_v25, %v176_v31  ;;  %v1028_v31 = vld [vmem:[%s3145_s4 + $0x18] sm:$0xff] }
 0x3c4   :  { %v2552_v54 = vpop.eup %2551 }
 0x3c5   :  { %v385_v57 = vmul.f32 %v2552_v54, %v293_v41 }
 0x428   :  { %v388_v55 = vpop.permute.xlu1 %387 }
 0x429   :  { %v390_v56 = vmul.f32 %v2552_v54, %v388_v55 }
 0x42b   :  { %392 = vrot.lane.b32.xlu0 %v390_v56, %s2671_s17 }
 0x49d   :  { %v393_v58 = vpop.permute.xlu0 %392 }
 0x49e   :  { %v395_v59 = vadd.f32 %v393_v58, %v385_v57 }
 0x4a0   :  { %2553 = vtanh.f32 %v395_v59 }
 0x4aa   :  { %v2554_v62 = vpop.eup %2553 }
 0x4ab   :  { %398 = vrot.lane.b32.xlu1 %v2554_v62, %s2670_s16 }
 0x51d   :  { %v399_v63 = vpop.permute.xlu1 %398 }
 0x51e   :  { %v401_v0 = vmul.f32 %v2552_v54, %v399_v63 }
 0x520   :  { %403 = vrot.lane.b32.xlu0 %v401_v0, %s2671_s17 }
 0x592   :  { %v404_v5 = vpop.permute.xlu0 %403 }
 0x593   :  { %406 = vst.msk [vmem:[#allocation2 + $0x8] sm:$0xff] %vm33_vm1, %v404_v5  ;;  %2248 = vmatmul.mubr.msk.f32.vlgmr.msra.gmra.mrb[4].mxu1 %vm33_vm1, %v404_v5 }
 0x594   :  { %2455 = vmatpush3.bf16.msra.mxu1 %v2758_v12  ;;  %2269 = vmatprep.mubr.msk.f32.mxu1 %vm2668_vm0, %v2669_v4 }
 0x595   :  { %2456 = vmatprep.subr.bf16.mxu1 %v2667_v3 }
 0x598   :  { %2458 = vmatpush3.bf16.msra.mxu1 %v2771_v17 }
 0x599   :  { %2465 = vmatprep.subr.bf16.mxu1 %v2667_v3 }
 0x666   :  { %v475_v7 = vpop.f32.mrb[4].mxu1 }
 0x667   :  { %v479_v8 = vadd.f32 %v475_v7, %v167_v6  ;;  %v2249_v9 = vpop.f32.mrb[5].mxu1 }
 0x668   :  { %v182_v9 = vadd.f32 %v2861_v30, %v2801_v25  ;;  %v1027_v30 = vld [vmem:[%s3145_s4 + $0x10] sm:$0xff]  ;;  %s2672_s4 = smov 96  }
 0x669   :  { %2555 = vtanh.f32 %v479_v8  ;;  %v2045_v11 = vmul.f32 -1.442695, %v479_v8 }
 0x66b   :  { %2557 = vpow2.f32 %v2045_v11 }
 0x673   :  { %v2556_v10 = vpop.eup %2555 }
 0x674   :  { %489 = vrot.lane.b32.xlu1 %v2556_v10, %s2670_s16 }
 0x675   :  { %v2558_v13 = vpop.eup %2557 }
 0x676   :  { %v483_v14 = vadd.f32 1.0, %v2558_v13 }
 0x678   :  { %2559 = vrcp.f32 %v483_v14 }
 0x682   :  { %v2560_v15 = vpop.eup %2559 }
 0x683   :  { %v487_v19 = vmul.f32 %v2560_v15, %v395_v59 }
 0x6e6   :  { %v490_v16 = vpop.permute.xlu1 %489 }
 0x6e7   :  { %v492_v18 = vmul.f32 %v2560_v15, %v490_v16 }
 0x6e9   :  { %494 = vrot.lane.b32.xlu0 %v492_v18, %s2671_s17 }
 0x75b   :  { %v495_v20 = vpop.permute.xlu0 %494 }
 0x75c   :  { %v497_v21 = vadd.f32 %v495_v20, %v487_v19 }
 0x75e   :  { %2561 = vtanh.f32 %v497_v21 }
 0x768   :  { %v2562_v27 = vpop.eup %2561 }
 0x769   :  { %500 = vrot.lane.b32.xlu1 %v2562_v27, %s2670_s16 }
 0x7db   :  { %v501_v28 = vpop.permute.xlu1 %500 }
 0x7dc   :  { %v503_v29 = vmul.f32 %v2560_v15, %v501_v28 }
 0x7de   :  { %505 = vrot.lane.b32.xlu0 %v503_v29, %s2671_s17 }
 0x850   :  { %v506_v34 = vpop.permute.xlu0 %505 }
 0x851   :  { %508 = vst.msk [vmem:[#allocation2 + $0x10] sm:$0xff] %vm33_vm1, %v506_v34  ;;  %2259 = vmatmul.mubr.msk.f32.vlgmr.msra.gmra.mrb[8].mxu0 %vm33_vm1, %v506_v34  ;;  %v2481_v34 = vpack.c.bf16 %v1028_v31, %v1027_v30 }
 0x852   :  { %2461 = vmatpush3.bf16.msra.mxu0 %v2758_v12  ;;  %2280 = vmatprep.mubr.msk.f32.mxu0 %vm2668_vm0, %v2669_v4 }
 0x853   :  { %2462 = vmatprep.subr.bf16.mxu0 %v2667_v3 }
 0x856   :  { %2464 = vmatpush3.bf16.msra.mxu0 %v2771_v17 }
 0x857   :  { %2471 = vmatprep.subr.bf16.mxu0 %v2667_v3 }
 0x924   :  { %v577_v36 = vpop.f32.mrb[8].mxu0 }
 0x925   :  { %v581_v37 = vadd.f32 %v577_v36, %v172_v35  ;;  %v2260_v38 = vpop.f32.mrb[9].mxu0  ;;  %v1034_v36 = vld [vmem:[#allocation2] sm:$0xff] }
 0x926   :  { %v1036_v38 = vld [vmem:[#allocation2 + $0x10] sm:$0xff] }
 0x927   :  { %2563 = vtanh.f32 %v581_v37  ;;  %v2047_v40 = vmul.f32 -1.442695, %v581_v37  ;;  %v1035_v37 = vld [vmem:[#allocation2 + $0x8] sm:$0xff] }
 0x929   :  { %2565 = vpow2.f32 %v2047_v40 }
 0x931   :  { %v2564_v39 = vpop.eup %2563 }
 0x932   :  { %591 = vrot.lane.b32.xlu1 %v2564_v39, %s2670_s16 }
 0x933   :  { %v2566_v41 = vpop.eup %2565 }
 0x934   :  { %v585_v42 = vadd.f32 1.0, %v2566_v41 }
 0x936   :  { %2567 = vrcp.f32 %v585_v42  ;;  %v187_v42 = vadd.f32 %v2801_v25, %v2865_v33 }
 0x940   :  { %v2568_v43 = vpop.eup %2567 }
 0x941   :  { %v589_v46 = vmul.f32 %v2568_v43, %v497_v21 }
 0x9a4   :  { %v592_v44 = vpop.permute.xlu1 %591 }
 0x9a5   :  { %v594_v45 = vmul.f32 %v2568_v43, %v592_v44 }
 0x9a7   :  { %596 = vrot.lane.b32.xlu0 %v594_v45, %s2671_s17 }
 0xa19   :  { %v597_v47 = vpop.permute.xlu0 %596 }
 0xa1a   :  { %v599_v48 = vadd.f32 %v597_v47, %v589_v46 }
 0xa1c   :  { %2569 = vtanh.f32 %v599_v48 }
 0xa26   :  { %v2570_v49 = vpop.eup %2569 }
 0xa27   :  { %602 = vrot.lane.b32.xlu1 %v2570_v49, %s2670_s16 }
 0xa99   :  { %v603_v50 = vpop.permute.xlu1 %602 }
 0xa9a   :  { %v605_v51 = vmul.f32 %v2568_v43, %v603_v50 }
 0xa9c   :  { %607 = vrot.lane.b32.xlu0 %v605_v51, %s2671_s17 }
 0xb0e   :  { %v608_v52 = vpop.permute.xlu0 %607 }
 0xb0f   :  { %610 = vst.msk [vmem:[#allocation2 + $0x18] sm:$0xff] %vm33_vm1, %v608_v52  ;;  %2270 = vmatmul.mubr.msk.f32.vlgmr.msra.gmra.mrb[6].mxu1 %vm33_vm1, %v608_v52 }
 0xb10   :  { %2467 = vmatpush3.bf16.msra.mxu1 %v2758_v12  ;;  %2291 = vmatprep.mubr.msk.f32.mxu1 %vm2668_vm0, %v2669_v4 }
 0xb11   :  { %2468 = vmatprep.subr.bf16.mxu1 %v2667_v3 }
 0xb14   :  { %2470 = vmatpush3.bf16.msra.mxu1 %v2771_v17 }
 0xb15   :  { %2478 = vmatprep.subr.bf16.mxu1 %v2477_v26 }
 0xb16   :  { %v1037_v39 = vld [vmem:[#allocation2 + $0x18] sm:$0xff] }
 0xbe2   :  { %v679_v54 = vpop.f32.mrb[6].mxu1 }
 0xbe3   :  { %v683_v55 = vadd.f32 %v679_v54, %v177_v53  ;;  %v2271_v56 = vpop.f32.mrb[7].mxu1 }
 0xbe5   :  { %2571 = vtanh.f32 %v683_v55  ;;  %v2049_v58 = vmul.f32 -1.442695, %v683_v55 }
 0xbe7   :  { %2573 = vpow2.f32 %v2049_v58 }
 0xbef   :  { %v2572_v57 = vpop.eup %2571 }
 0xbf0   :  { %693 = vrot.lane.b32.xlu1 %v2572_v57, %s2670_s16 }
 0xbf1   :  { %v2574_v59 = vpop.eup %2573 }
 0xbf2   :  { %v687_v60 = vadd.f32 1.0, %v2574_v59 }
 0xbf4   :  { %2575 = vrcp.f32 %v687_v60 }
 0xbfe   :  { %v2576_v61 = vpop.eup %2575 }
 0xbff   :  { %v691_v0 = vmul.f32 %v2576_v61, %v599_v48 }
 0xc62   :  { %v694_v62 = vpop.permute.xlu1 %693 }
 0xc63   :  { %v696_v63 = vmul.f32 %v2576_v61, %v694_v62  ;;  %v1029_v62 = vld [vmem:[%s3146_s5] sm:$0xff] }
 0xc65   :  { %698 = vrot.lane.b32.xlu0 %v696_v63, %s2671_s17  ;;  %v1030_v63 = vld [vmem:[%s3146_s5 + $0x8] sm:$0xff] }
 0xcd7   :  { %v699_v1 = vpop.permute.xlu0 %698 }
 0xcd8   :  { %v701_v2 = vadd.f32 %v699_v1, %v691_v0  ;;  %v2951_v0 = vpack.c.bf16 %v1030_v63, %v1029_v62  ;;  %v1031_v1 = vld [vmem:[%s3146_s5 + $0x10] sm:$0xff] }
 0xcda   :  { %2577 = vtanh.f32 %v701_v2 }
 0xce4   :  { %v2578_v5 = vpop.eup %2577 }
 0xce5   :  { %704 = vrot.lane.b32.xlu1 %v2578_v5, %s2670_s16 }
 0xd57   :  { %v705_v6 = vpop.permute.xlu1 %704 }
 0xd58   :  { %v707_v7 = vmul.f32 %v2576_v61, %v705_v6 }
 0xd5a   :  { %709 = vrot.lane.b32.xlu0 %v707_v7, %s2671_s17 }
 0xdcc   :  { %v710_v8 = vpop.permute.xlu0 %709 }
 0xdcd   :  { %712 = vst.msk [vmem:[#allocation2 + $0x20] sm:$0xff] %vm33_vm1, %v710_v8  ;;  %2281 = vmatmul.mubr.msk.f32.vlgmr.msra.gmra.mrb[10].mxu0 %vm33_vm1, %v710_v8  ;;  %v1180_v8 = vld [vmem:[#allocation4 + $0x8] sm:$0xff] }
 0xdce   :  { %2473 = vmatpush3.bf16.msra.mxu0 %v2758_v12  ;;  %2302 = vmatprep.mubr.msk.f32.mxu0 %vm2668_vm0, %v2669_v4 }
 0xdcf   :  { %2474 = vmatprep.subr.bf16.mxu0 %v2667_v3 }
 0xdd2   :  { %2476 = vmatpush3.bf16.msra.mxu0 %v2771_v17 }
 0xdd3   :  { %2485 = vmatprep.subr.bf16.mxu0 %v2667_v3 }
 0xdd4   :  { %v1038_v40 = vld [vmem:[#allocation2 + $0x20] sm:$0xff] }
 0xea0   :  { %v781_v10 = vpop.f32.mrb[10].mxu0 }
 0xea1   :  { %v785_v11 = vadd.f32 %v781_v10, %v182_v9  ;;  %v2282_v13 = vpop.f32.mrb[11].mxu0  ;;  %v1178_v10 = vld [vmem:[#allocation3 + $0x8] sm:$0xff] }
 0xea2   :  { %v192_v13 = vadd.f32 %v2863_v32, %v2801_v25 }
 0xea3   :  { %2579 = vtanh.f32 %v785_v11  ;;  %v2051_v12 = vmul.f32 -1.442695, %v785_v11 }
 0xea5   :  { %2581 = vpow2.f32 %v2051_v12 }
 0xead   :  { %v2580_v14 = vpop.eup %2579 }
 0xeae   :  { %795 = vrot.lane.b32.xlu1 %v2580_v14, %s2670_s16 }
 0xeaf   :  { %v2582_v15 = vpop.eup %2581 }
 0xeb0   :  { %v789_v16 = vadd.f32 1.0, %v2582_v15 }
 0xeb2   :  { %2583 = vrcp.f32 %v789_v16  ;;  %v2988_v16 = vld [vmem:[%s3147_s6] ss:$0 sm:$0xff] }
 0xebc   :  { %v2584_v18 = vpop.eup %2583 }
 0xebd   :  { %v793_v20 = vmul.f32 %v2584_v18, %v701_v2  ;;  %v1032_v2 = vld [vmem:[%s3146_s5 + $0x18] sm:$0xff] }
 0xebe   :  { %v2961_v5 = vpack.c.bf16 %v1032_v2, %v1031_v1 }
 0xf20   :  { %v796_v19 = vpop.permute.xlu1 %795 }
 0xf21   :  { %v798_v17 = vmul.f32 %v2584_v18, %v796_v19 }
 0xf23   :  { %800 = vrot.lane.b32.xlu0 %v798_v17, %s2671_s17 }
 0xf95   :  { %v801_v21 = vpop.permute.xlu0 %800 }
 0xf96   :  { %v803_v22 = vadd.f32 %v801_v21, %v793_v20 }
 0xf98   :  { %2585 = vtanh.f32 %v803_v22 }
 0xfa2   :  { %v2586_v27 = vpop.eup %2585 }
 0xfa3   :  { %806 = vrot.lane.b32.xlu1 %v2586_v27, %s2670_s16 }
0x1015   :  { %v807_v28 = vpop.permute.xlu1 %806 }
0x1016   :  { %v809_v29 = vmul.f32 %v2584_v18, %v807_v28 }
0x1018   :  { %811 = vrot.lane.b32.xlu0 %v809_v29, %s2671_s17 }
0x108a   :  { %v812_v35 = vpop.permute.xlu0 %811 }
0x108b   :  { %814 = vst.msk [vmem:[#allocation2 + $0x28] sm:$0xff] %vm33_vm1, %v812_v35  ;;  %2292 = vmatmul.mubr.msk.f32.vlgmr.msra.gmra.mrb[8].mxu1 %vm33_vm1, %v812_v35 }
0x108c   :  { %2480 = vmatpush3.bf16.msra.mxu1 %v2477_v26  ;;  %2313 = vmatprep.mubr.msk.f32.mxu1 %vm33_vm1, %v1034_v36 }
0x108d   :  { %2482 = vmatprep.subr.bf16.mxu1 %v2481_v34 }
0x1090   :  { %2484 = vmatpush3.bf16.msra.mxu1 %v2481_v34 }
0x1091   :  { %2497 = vmatprep.subr.bf16.mxu1 %v2667_v3 }
0x1092   :  { %v1039_v41 = vld [vmem:[#allocation2 + $0x28] sm:$0xff] }
0x1093   :  { %2314 = vmatmul.mubr.msk.f32.vlgmr.msra.gmra.mrb[10].mxu1 %vm33_vm1, %v1035_v37 }
0x1094   :  { %2316 = vmatprep.mubr.msk.f32.mxu1 %vm33_vm1, %v1036_v38  ;;  %2499 = vmatpush3.bf16.msra.mxu1 %v2951_v0 }
0x1095   :  { %2500 = vmatprep.subr.bf16.mxu1 %v2667_v3 }
0x1097   :  { %2317 = vmatmul.mubr.msk.f32.gmra.mrb[12].mxu1 %vm33_vm1, %v1037_v39 }
0x1098   :  { %2319 = vmatprep.mubr.msk.f32.mxu1 %vm33_vm1, %v1038_v40  ;;  %2502 = vmatpush3.bf16.msra.mxu1 %v2961_v5 }
0x1099   :  { %2509 = vmatprep.subr.bf16.mxu1 %v2667_v3 }
0x109b   :  { %2320 = vmatmul.mubr.msk.f32.gmra.mrb[14].mxu1 %vm33_vm1, %v1039_v41 }
0x115e   :  { %v883_v43 = vpop.f32.mrb[8].mxu1 }
0x115f   :  { %v887_v44 = vadd.f32 %v883_v43, %v187_v42  ;;  %v2293_v45 = vpop.f32.mrb[9].mxu1 }
0x1161   :  { %2587 = vtanh.f32 %v887_v44  ;;  %v2053_v53 = vmul.f32 -1.442695, %v887_v44 }
0x1163   :  { %2589 = vpow2.f32 %v2053_v53 }
0x1166   :  { %v2929_v46 = vpop.f32.mrb[10].mxu1 }
0x1167   :  { %v1138_v47 = vpop.f32.mrb[11].mxu1 }
0x1168   :  { %v1139_v18 = vadd.f32 %v2988_v16, %v1138_v47 }
0x116a   :  { %v2931_v48 = vpop.f32.mrb[12].mxu1 }
0x116b   :  { %v2588_v49 = vpop.eup %2587  ;;  %v2933_v50 = vpop.f32.mrb[13].mxu1 }
0x116c   :  { %897 = vrot.lane.b32.xlu1 %v2588_v49, %s2670_s16 }
0x116d   :  { %v2590_v33 = vpop.eup %2589 }
0x116e   :  { %v2936_v51 = vpop.f32.mrb[14].mxu1  ;;  %v891_v54 = vadd.f32 1.0, %v2590_v33 }
0x116f   :  { %v2938_v52 = vpop.f32.mrb[15].mxu1 }
0x1170   :  { %2591 = vrcp.f32 %v891_v54  ;;  %v1144_v54 = vadd.f32 %v2929_v46, %v2988_v16 }
0x117a   :  { %v2592_v55 = vpop.eup %2591 }
0x117b   :  { %v895_v58 = vmul.f32 %v2592_v55, %v803_v22 }
0x11de   :  { %v898_v56 = vpop.permute.xlu1 %897 }
0x11df   :  { %v900_v57 = vmul.f32 %v2592_v55, %v898_v56 }
0x11e1   :  { %902 = vrot.lane.b32.xlu0 %v900_v57, %s2671_s17 }
0x1253   :  { %v903_v59 = vpop.permute.xlu0 %902 }
0x1254   :  { %v2941_v60 = vadd.f32 %v903_v59, %v895_v58 }
0x1256   :  { %2593 = vtanh.f32 %v2941_v60 }
0x1260   :  { %v2594_v61 = vpop.eup %2593 }
0x1261   :  { %908 = vrot.lane.b32.xlu1 %v2594_v61, %s2670_s16 }
0x12d3   :  { %v909_v6 = vpop.permute.xlu1 %908 }
0x12d4   :  { %v911_v7 = vmul.f32 %v2592_v55, %v909_v6 }
0x12d6   :  { %913 = vrot.lane.b32.xlu0 %v911_v7, %s2671_s17 }
0x12da   :  { %1263 = vrot.lane.b32.xlu0 %v1180_v8, %s2671_s17 }
0x1348   :  { %v914_v9 = vpop.permute.xlu0 %913 }
0x1349   :  { %916 = vst.msk [vmem:[#allocation2 + $0x30] sm:$0xff] %vm33_vm1, %v914_v9  ;;  %2303 = vmatmul.mubr.msk.f32.vlgmr.msra.gmra.mrb[12].mxu0 %vm33_vm1, %v914_v9 }
0x134a   :  { %2487 = vmatpush3.bf16.msra.mxu0 %v2951_v0  ;;  %2333 = vmatprep.mubr.msk.f32.mxu0 %vm2668_vm0, %v2669_v4 }
0x134b   :  { %2488 = vmatprep.subr.bf16.mxu0 %v2667_v3 }
0x134c   :  { %v1264_v27 = vpop.permute.xlu0 %1263 }
0x134e   :  { %2490 = vmatpush3.bf16.msra.mxu0 %v2961_v5 }
0x134f   :  { %2491 = vmatprep.subr.bf16.mxu0 %v2667_v3 }
0x1350   :  { %v1040_v11 = vld [vmem:[#allocation2 + $0x30] sm:$0xff] }
0x1351   :  { %2334 = vmatmul.mubr.msk.f32.vlgmr.msra.gmra.mrb[14].mxu0 %vm33_vm1, %v1178_v10  ;;  %2322 = vmatprep.mubr.msk.f32.mxu1 %vm33_vm1, %v1040_v11 }
0x1352   :  { %2493 = vmatpush3.bf16.msra.mxu0 %v2951_v0  ;;  %2344 = vmatprep.mubr.msk.f32.mxu0 %vm2668_vm0, %v2669_v4 }
0x1353   :  { %2494 = vmatprep.subr.bf16.mxu0 %v2667_v3 }
0x1356   :  { %2496 = vmatpush3.bf16.msra.mxu0 %v2961_v5 }
0x1357   :  { %2503 = vmatprep.subr.bf16.mxu0 %v2667_v3 }
0x141c   :  { %v985_v14 = vpop.f32.mrb[12].mxu0 }
0x141d   :  { %v989_v12 = vadd.f32 %v985_v14, %v192_v13  ;;  %v2304_v15 = vpop.f32.mrb[13].mxu0 }
0x141f   :  { %v2055_v35 = vmul.f32 -1.442695, %v989_v12 }
0x1424   :  { %v1250_v19 = vpop.f32.mrb[14].mxu0 }
0x1425   :  { %v1254_v17 = vadd.f32 %v1250_v19, %v1139_v18  ;;  %v2335_v20 = vpop.f32.mrb[15].mxu0  ;;  %v1149_v18 = vadd.f32 %v2988_v16, %v2933_v50 }
0x1427   :  { %2595 = vtanh.f32 %v1254_v17  ;;  %v2066_v22 = vmul.f32 -1.442695, %v1254_v17 }
0x1429   :  { %2597 = vpow2.f32 %v2066_v22 }
0x1431   :  { %v2596_v21 = vpop.eup %2595 }
0x1432   :  { %1268 = vrot.lane.b32.xlu1 %v2596_v21, %s2670_s16 }
0x1433   :  { %v2598_v25 = vpop.eup %2597 }
0x1434   :  { %v1258_v32 = vadd.f32 1.0, %v2598_v25 }
0x1436   :  { %2599 = vrcp.f32 %v1258_v32 }
0x1440   :  { %v2600_v23 = vpop.eup %2599 }
0x1441   :  { %v1266_v28 = vmul.f32 %v2600_v23, %v1264_v27 }
0x14a4   :  { %v1269_v24 = vpop.permute.xlu1 %1268 }
0x14a5   :  { %v1271_v26 = vmul.f32 %v2600_v23, %v1269_v24 }
0x14a7   :  { %1273 = vrot.lane.b32.xlu1 %v1271_v26, %s2671_s17 }
0x1519   :  { %v1274_v29 = vpop.permute.xlu1 %1273 }
0x151a   :  { %v1276_v30 = vadd.f32 %v1274_v29, %v1266_v28 }
0x151c   :  { %2601 = vtanh.f32 %v1276_v30 }
0x151d   :  { %2603 = vtanh.f32 %v989_v12 }
0x151e   :  { %2605 = vpow2.f32 %v2055_v35  ;;  %v1154_v35 = vadd.f32 %v2931_v48, %v2988_v16 }
0x1526   :  { %v2602_v31 = vpop.eup %2601 }
0x1527   :  { %1279 = vrot.lane.b32.xlu0 %v2602_v31, %s2670_s16  ;;  %v2604_v34 = vpop.eup %2603 }
0x1528   :  { %v2606_v36 = vpop.eup %2605 }
0x1529   :  { %v993_v37 = vadd.f32 1.0, %v2606_v36 }
0x152b   :  { %999 = vrot.lane.b32.xlu0 %v2604_v34, %s2670_s16  ;;  %2607 = vrcp.f32 %v993_v37 }
0x1535   :  { %v2608_v40 = vpop.eup %2607 }
0x1536   :  { %v997_v44 = vmul.f32 %v2608_v40, %v2941_v60 }
0x1599   :  { %v1280_v38 = vpop.permute.xlu0 %1279 }
0x159a   :  { %v1282_v39 = vmul.f32 %v2600_v23, %v1280_v38 }
0x159c   :  { %1284 = vrot.lane.b32.xlu1 %v1282_v39, %s2671_s17 }
0x159d   :  { %v1000_v41 = vpop.permute.xlu0 %999 }
0x159e   :  { %v1002_v42 = vmul.f32 %v2608_v40, %v1000_v41 }
0x15a0   :  { %1004 = vrot.lane.b32.xlu0 %v1002_v42, %s2671_s17 }
0x160e   :  { %v1285_v43 = vpop.permute.xlu1 %1284 }
0x160f   :  { %1287 = vst.msk [vmem:[%s3148_s7] sm:$0xff] %vm33_vm1, %v1285_v43  ;;  %2345 = vmatmul.mubr.msk.f32.vlgmr.msra.gmra.mrb[16].mxu0 %vm33_vm1, %v1285_v43 }
0x1610   :  { %2505 = vmatpush3.bf16.msra.mxu0 %v2951_v0  ;;  %2366 = vmatprep.mubr.msk.f32.mxu0 %vm2668_vm0, %v2669_v4 }
0x1611   :  { %2506 = vmatprep.subr.bf16.mxu0 %v2667_v3 }
0x1612   :  { %v1005_v45 = vpop.permute.xlu0 %1004 }
0x1613   :  { %v3007_v47 = vadd.f32 %v1005_v45, %v997_v44 }
0x1614   :  { %2508 = vmatpush3.bf16.msra.mxu0 %v2961_v5 }
0x1615   :  { %2609 = vtanh.f32 %v3007_v47  ;;  %2515 = vmatprep.subr.bf16.mxu0 %v2667_v3 }
0x161f   :  { %v2610_v49 = vpop.eup %2609 }
0x1620   :  { %1010 = vrot.lane.b32.xlu0 %v2610_v49, %s2670_s16 }
0x1692   :  { %v1011_v53 = vpop.permute.xlu0 %1010 }
0x1693   :  { %v1013_v33 = vmul.f32 %v2608_v40, %v1011_v53 }
0x1695   :  { %1015 = vrot.lane.b32.xlu0 %v1013_v33, %s2671_s17 }
0x16e2   :  { %v1356_v55 = vpop.f32.mrb[16].mxu0 }
0x16e3   :  { %v1360_v56 = vadd.f32 %v1356_v55, %v1144_v54  ;;  %v2346_v57 = vpop.f32.mrb[17].mxu0 }
0x16e4   :  { %v1159_v57 = vadd.f32 %v2988_v16, %v2938_v52 }
0x16e5   :  { %2611 = vtanh.f32 %v1360_v56  ;;  %v2068_v46 = vmul.f32 -1.442695, %v1360_v56 }
0x16e7   :  { %2613 = vpow2.f32 %v2068_v46 }
0x16ef   :  { %v2612_v58 = vpop.eup %2611 }
0x16f0   :  { %1370 = vrot.lane.b32.xlu1 %v2612_v58, %s2670_s16 }
0x16f1   :  { %v2614_v62 = vpop.eup %2613 }
0x16f2   :  { %v1364_v63 = vadd.f32 1.0, %v2614_v62 }
0x16f4   :  { %2615 = vrcp.f32 %v1364_v63 }
0x16fe   :  { %v2616_v1 = vpop.eup %2615 }
0x16ff   :  { %v1368_v7 = vmul.f32 %v2616_v1, %v1276_v30 }
0x1707   :  { %v1016_v59 = vpop.permute.xlu0 %1015 }
0x1708   :  { %1018 = vst.msk [vmem:[#allocation2 + $0x38] sm:$0xff] %vm33_vm1, %v1016_v59  ;;  %1019 = vst.msk [vmem:[#allocation3] sm:$0xff] %vm33_vm1, %v1016_v59 }
0x170f   :  { %v2011_v60 = vld [vmem:[#allocation3] sm:$0xff]  ;;  %v1041_v61 = vld [vmem:[#allocation2 + $0x38] sm:$0xff] }
0x1710   :  { %2013 = vst.msk [vmem:[%s3149_s8] sm:$0xff] %vm33_vm1, %v2011_v60  ;;  %2323 = vmatmul.mubr.msk.f32.gmra.mrb[16].mxu1 %vm33_vm1, %v1041_v61 }
0x1711   :  { %2355 = vmatprep.mubr.msk.f32.mxu1 %vm2668_vm0, %v2669_v4 }
0x1762   :  { %v1371_v2 = vpop.permute.xlu1 %1370 }
0x1763   :  { %v1373_v6 = vmul.f32 %v2616_v1, %v1371_v2 }
0x1765   :  { %1375 = vrot.lane.b32.xlu1 %v1373_v6, %s2671_s17 }
0x17d7   :  { %v1376_v8 = vpop.permute.xlu1 %1375 }
0x17d8   :  { %v1378_v9 = vadd.f32 %v1376_v8, %v1368_v7 }
0x17da   :  { %2617 = vtanh.f32 %v1378_v9 }
0x17e3   :  { %v3027_v10 = vpop.f32.mrb[16].mxu1 }
0x17e4   :  { %v2618_v11 = vpop.eup %2617  ;;  %v3029_v13 = vpop.f32.mrb[17].mxu1 }
0x17e5   :  { %1381 = vrot.lane.b32.xlu1 %v2618_v11, %s2670_s16 }
0x1857   :  { %v1382_v14 = vpop.permute.xlu1 %1381 }
0x1858   :  { %v1384_v12 = vmul.f32 %v2616_v1, %v1382_v14 }
0x185a   :  { %1386 = vrot.lane.b32.xlu1 %v1384_v12, %s2671_s17 }
0x18cc   :  { %v1387_v15 = vpop.permute.xlu1 %1386 }
0x18cd   :  { %1389 = vst.msk [vmem:[%s3148_s7 + $0x8] sm:$0xff] %vm33_vm1, %v1387_v15  ;;  %2356 = vmatmul.mubr.msk.f32.vlgmr.msra.gmra.mrb[18].mxu1 %vm33_vm1, %v1387_v15  ;;  %v1164_v15 = vadd.f32 %v2936_v51, %v2988_v16 }
0x18ce   :  { %2511 = vmatpush3.bf16.msra.mxu1 %v2951_v0  ;;  %2377 = vmatprep.mubr.msk.f32.mxu1 %vm2668_vm0, %v2669_v4 }
0x18cf   :  { %2512 = vmatprep.subr.bf16.mxu1 %v2667_v3 }
0x18d2   :  { %2514 = vmatpush3.bf16.msra.mxu1 %v2961_v5 }
0x18d3   :  { %2521 = vmatprep.subr.bf16.mxu1 %v2667_v3 }
0x19a0   :  { %v1458_v19 = vpop.f32.mrb[18].mxu1 }
0x19a1   :  { %v1462_v17 = vadd.f32 %v1458_v19, %v1149_v18  ;;  %v2357_v20 = vpop.f32.mrb[19].mxu1 }
0x19a3   :  { %2619 = vtanh.f32 %v1462_v17  ;;  %v2070_v22 = vmul.f32 -1.442695, %v1462_v17 }
0x19a5   :  { %2621 = vpow2.f32 %v2070_v22 }
0x19ad   :  { %v2620_v21 = vpop.eup %2619 }
0x19ae   :  { %1472 = vrot.lane.b32.xlu0 %v2620_v21, %s2670_s16 }
0x19af   :  { %v2622_v25 = vpop.eup %2621 }
0x19b0   :  { %v1466_v32 = vadd.f32 1.0, %v2622_v25 }
0x19b2   :  { %2623 = vrcp.f32 %v1466_v32 }
0x19bc   :  { %v2624_v23 = vpop.eup %2623 }
0x19bd   :  { %v1470_v27 = vmul.f32 %v2624_v23, %v1378_v9 }
0x1a20   :  { %v1473_v24 = vpop.permute.xlu0 %1472 }
0x1a21   :  { %v1475_v26 = vmul.f32 %v2624_v23, %v1473_v24 }
0x1a23   :  { %1477 = vrot.lane.b32.xlu1 %v1475_v26, %s2671_s17 }
0x1a95   :  { %v1478_v28 = vpop.permute.xlu1 %1477 }
0x1a96   :  { %v1480_v50 = vadd.f32 %v1478_v28, %v1470_v27  ;;  %v1169_v28 = vadd.f32 %v2988_v16, %v3029_v13 }
0x1a98   :  { %2625 = vtanh.f32 %v1480_v50 }
0x1aa2   :  { %v2626_v29 = vpop.eup %2625 }
0x1aa3   :  { %1483 = vrot.lane.b32.xlu0 %v2626_v29, %s2670_s16 }
0x1b15   :  { %v1484_v30 = vpop.permute.xlu0 %1483 }
0x1b16   :  { %v1486_v31 = vmul.f32 %v2624_v23, %v1484_v30 }
0x1b18   :  { %1488 = vrot.lane.b32.xlu1 %v1486_v31, %s2671_s17 }
0x1b8a   :  { %v1489_v34 = vpop.permute.xlu1 %1488 }
0x1b8b   :  { %1491 = vst.msk [vmem:[%s3148_s7 + $0x10] sm:$0xff] %vm33_vm1, %v1489_v34  ;;  %2367 = vmatmul.mubr.msk.f32.vlgmr.msra.gmra.mrb[18].mxu0 %vm33_vm1, %v1489_v34 }
0x1b8c   :  { %2517 = vmatpush3.bf16.msra.mxu0 %v2951_v0  ;;  %2388 = vmatprep.mubr.msk.f32.mxu0 %vm2668_vm0, %v2669_v4 }
0x1b8d   :  { %2518 = vmatprep.subr.bf16.mxu0 %v2667_v3 }
0x1b90   :  { %2520 = vmatpush3.bf16.msra.mxu0 %v2961_v5 }
0x1b91   :  { %2527 = vmatprep.subr.bf16.mxu0 %v2667_v3 }
0x1c5e   :  { %v1560_v36 = vpop.f32.mrb[18].mxu0 }
0x1c5f   :  { %v1564_v37 = vadd.f32 %v1560_v36, %v1154_v35  ;;  %v2368_v38 = vpop.f32.mrb[19].mxu0 }
0x1c61   :  { %2627 = vtanh.f32 %v1564_v37  ;;  %v2072_v40 = vmul.f32 -1.442695, %v1564_v37 }
0x1c63   :  { %2629 = vpow2.f32 %v2072_v40 }
0x1c6b   :  { %v2628_v39 = vpop.eup %2627 }
0x1c6c   :  { %1574 = vrot.lane.b32.xlu0 %v2628_v39, %s2670_s16 }
0x1c6d   :  { %v2630_v41 = vpop.eup %2629 }
0x1c6e   :  { %v1568_v42 = vadd.f32 1.0, %v2630_v41 }
0x1c70   :  { %2631 = vrcp.f32 %v1568_v42 }
0x1c7a   :  { %v2632_v43 = vpop.eup %2631 }
0x1c7b   :  { %v1572_v49 = vmul.f32 %v2632_v43, %v1480_v50 }
0x1cde   :  { %v1575_v44 = vpop.permute.xlu0 %1574 }
0x1cdf   :  { %v1577_v45 = vmul.f32 %v2632_v43, %v1575_v44 }
0x1ce1   :  { %1579 = vrot.lane.b32.xlu1 %v1577_v45, %s2671_s17 }
0x1d53   :  { %v1580_v53 = vpop.permute.xlu1 %1579 }
0x1d54   :  { %v1582_v48 = vadd.f32 %v1580_v53, %v1572_v49  ;;  %v1174_v49 = vadd.f32 %v3027_v10, %v2988_v16 }
0x1d56   :  { %2633 = vtanh.f32 %v1582_v48 }
0x1d60   :  { %v2634_v33 = vpop.eup %2633 }
0x1d61   :  { %1585 = vrot.lane.b32.xlu0 %v2634_v33, %s2670_s16 }
0x1dd3   :  { %v1586_v54 = vpop.permute.xlu0 %1585 }
0x1dd4   :  { %v1588_v55 = vmul.f32 %v2632_v43, %v1586_v54 }
0x1dd6   :  { %1590 = vrot.lane.b32.xlu1 %v1588_v55, %s2671_s17 }
0x1e48   :  { %v1591_v56 = vpop.permute.xlu1 %1590 }
0x1e49   :  { %1593 = vst.msk [vmem:[%s3148_s7 + $0x18] sm:$0xff] %vm33_vm1, %v1591_v56  ;;  %2378 = vmatmul.mubr.msk.f32.vlgmr.msra.gmra.mrb[20].mxu1 %vm33_vm1, %v1591_v56 }
0x1e4a   :  { %2523 = vmatpush3.bf16.msra.mxu1 %v2951_v0  ;;  %2399 = vmatprep.mubr.msk.f32.mxu1 %vm2668_vm0, %v2669_v4 }
0x1e4b   :  { %2524 = vmatprep.subr.bf16.mxu1 %v2667_v3 }
0x1e4e   :  { %2526 = vmatpush3.bf16.msra.mxu1 %v2961_v5 }
0x1f1c   :  { %v1662_v58 = vpop.f32.mrb[20].mxu1 }
0x1f1d   :  { %v1666_v59 = vadd.f32 %v1662_v58, %v1159_v57  ;;  %v2379_v60 = vpop.f32.mrb[21].mxu1 }
0x1f1f   :  { %2635 = vtanh.f32 %v1666_v59  ;;  %v2074_v46 = vmul.f32 -1.442695, %v1666_v59 }
0x1f21   :  { %2637 = vpow2.f32 %v2074_v46 }
0x1f29   :  { %v2636_v61 = vpop.eup %2635 }
0x1f2a   :  { %1676 = vrot.lane.b32.xlu0 %v2636_v61, %s2670_s16 }
0x1f2b   :  { %v2638_v62 = vpop.eup %2637 }
0x1f2c   :  { %v1670_v63 = vadd.f32 1.0, %v2638_v62 }
0x1f2e   :  { %2639 = vrcp.f32 %v1670_v63 }
0x1f38   :  { %v2640_v1 = vpop.eup %2639 }
0x1f39   :  { %v1674_v7 = vmul.f32 %v2640_v1, %v1582_v48 }
0x1f9c   :  { %v1677_v2 = vpop.permute.xlu0 %1676 }
0x1f9d   :  { %v1679_v6 = vmul.f32 %v2640_v1, %v1677_v2 }
0x1f9f   :  { %1681 = vrot.lane.b32.xlu1 %v1679_v6, %s2671_s17 }
0x2011   :  { %v1682_v8 = vpop.permute.xlu1 %1681 }
0x2012   :  { %v1684_v52 = vadd.f32 %v1682_v8, %v1674_v7 }
0x2014   :  { %2641 = vtanh.f32 %v1684_v52 }
0x201e   :  { %v2642_v9 = vpop.eup %2641 }
0x201f   :  { %1687 = vrot.lane.b32.xlu0 %v2642_v9, %s2670_s16 }
0x2091   :  { %v1688_v11 = vpop.permute.xlu0 %1687 }
0x2092   :  { %v1690_v14 = vmul.f32 %v2640_v1, %v1688_v11 }
0x2094   :  { %1692 = vrot.lane.b32.xlu1 %v1690_v14, %s2671_s17 }
0x2106   :  { %v1693_v12 = vpop.permute.xlu1 %1692 }
0x2107   :  { %1695 = vst.msk [vmem:[%s3148_s7 + $0x20] sm:$0xff] %vm33_vm1, %v1693_v12  ;;  %2389 = vmatmul.mubr.msk.f32.vlgmr.msra.gmra.mrb[20].mxu0 %vm33_vm1, %v1693_v12 }
0x2108   :  { %2529 = vmatpush3.bf16.msra.mxu0 %v2951_v0  ;;  %2410 = vmatprep.mubr.msk.f32.mxu0 %vm2668_vm0, %v2669_v4 }
0x2109   :  { %2530 = vmatprep.subr.bf16.mxu0 %v2667_v3 }
0x210c   :  { %2532 = vmatpush3.bf16.msra.mxu0 %v2961_v5 }
0x21da   :  { %v1764_v18 = vpop.f32.mrb[20].mxu0 }
0x21db   :  { %v1768_v19 = vadd.f32 %v1764_v18, %v1164_v15  ;;  %v2390_v17 = vpop.f32.mrb[21].mxu0 }
0x21dd   :  { %2643 = vtanh.f32 %v1768_v19  ;;  %v2076_v21 = vmul.f32 -1.442695, %v1768_v19 }
0x21df   :  { %2645 = vpow2.f32 %v2076_v21 }
0x21e7   :  { %v2644_v20 = vpop.eup %2643 }
0x21e8   :  { %1778 = vrot.lane.b32.xlu0 %v2644_v20, %s2670_s16 }
0x21e9   :  { %v2646_v0 = vpop.eup %2645 }
0x21ea   :  { %v1772_v22 = vadd.f32 1.0, %v2646_v0 }
0x21ec   :  { %2647 = vrcp.f32 %v1772_v22 }
0x21f6   :  { %v2648_v4 = vpop.eup %2647 }
0x21f7   :  { %v1776_v5 = vmul.f32 %v2648_v4, %v1684_v52 }
0x225a   :  { %v1779_v25 = vpop.permute.xlu0 %1778 }
0x225b   :  { %v1781_v3 = vmul.f32 %v2648_v4, %v1779_v25 }
0x225d   :  { %1783 = vrot.lane.b32.xlu1 %v1781_v3, %s2671_s17 }
0x22cf   :  { %v1784_v32 = vpop.permute.xlu1 %1783 }
0x22d0   :  { %v1786_v51 = vadd.f32 %v1784_v32, %v1776_v5 }
0x22d2   :  { %2649 = vtanh.f32 %v1786_v51 }
0x22dc   :  { %v2650_v23 = vpop.eup %2649 }
0x22dd   :  { %1789 = vrot.lane.b32.xlu0 %v2650_v23, %s2670_s16 }
0x234f   :  { %v1790_v24 = vpop.permute.xlu0 %1789 }
0x2350   :  { %v1792_v26 = vmul.f32 %v2648_v4, %v1790_v24 }
0x2352   :  { %1794 = vrot.lane.b32.xlu1 %v1792_v26, %s2671_s17 }
0x23c4   :  { %v1795_v27 = vpop.permute.xlu1 %1794 }
0x23c5   :  { %1797 = vst.msk [vmem:[%s3148_s7 + $0x28] sm:$0xff] %vm33_vm1, %v1795_v27  ;;  %2400 = vmatmul.mubr.msk.f32.vlgmr.msra.gmra.mrb[22].mxu1 %vm33_vm1, %v1795_v27 }
0x2498   :  { %v1866_v50 = vpop.f32.mrb[22].mxu1 }
0x2499   :  { %v1870_v29 = vadd.f32 %v1866_v50, %v1169_v28  ;;  %v2401_v30 = vpop.f32.mrb[23].mxu1 }
0x249b   :  { %2651 = vtanh.f32 %v1870_v29  ;;  %v2078_v34 = vmul.f32 -1.442695, %v1870_v29 }
0x249d   :  { %2653 = vpow2.f32 %v2078_v34 }
0x24a5   :  { %v2652_v31 = vpop.eup %2651 }
0x24a6   :  { %1880 = vrot.lane.b32.xlu0 %v2652_v31, %s2670_s16 }
0x24a7   :  { %v2654_v35 = vpop.eup %2653 }
0x24a8   :  { %v1874_v36 = vadd.f32 1.0, %v2654_v35 }
0x24aa   :  { %2655 = vrcp.f32 %v1874_v36 }
0x24b4   :  { %v2656_v37 = vpop.eup %2655 }
0x24b5   :  { %v1878_v40 = vmul.f32 %v2656_v37, %v1786_v51 }
0x2518   :  { %v1881_v38 = vpop.permute.xlu0 %1880 }
0x2519   :  { %v1883_v39 = vmul.f32 %v2656_v37, %v1881_v38 }
0x251b   :  { %1885 = vrot.lane.b32.xlu1 %v1883_v39, %s2671_s17 }
0x258d   :  { %v1886_v41 = vpop.permute.xlu1 %1885 }
0x258e   :  { %v1888_v13 = vadd.f32 %v1886_v41, %v1878_v40 }
0x2590   :  { %2657 = vtanh.f32 %v1888_v13 }
0x259a   :  { %v2658_v42 = vpop.eup %2657 }
0x259b   :  { %1891 = vrot.lane.b32.xlu0 %v2658_v42, %s2670_s16 }
0x260d   :  { %v1892_v43 = vpop.permute.xlu0 %1891 }
0x260e   :  { %v1894_v44 = vmul.f32 %v2656_v37, %v1892_v43 }
0x2610   :  { %1896 = vrot.lane.b32.xlu1 %v1894_v44, %s2671_s17 }
0x2682   :  { %v1897_v45 = vpop.permute.xlu1 %1896 }
0x2683   :  { %1899 = vst.msk [vmem:[%s3148_s7 + $0x30] sm:$0xff] %vm33_vm1, %v1897_v45  ;;  %2411 = vmatmul.mubr.msk.f32.vlgmr.msra.gmra.mrb[22].mxu0 %vm33_vm1, %v1897_v45 }
0x2756   :  { %v1968_v53 = vpop.f32.mrb[22].mxu0 }
0x2757   :  { %v1972_v48 = vadd.f32 %v1968_v53, %v1174_v49  ;;  %v2412_v33 = vpop.f32.mrb[23].mxu0 }
0x2759   :  { %2659 = vtanh.f32 %v1972_v48  ;;  %v2080_v55 = vmul.f32 -1.442695, %v1972_v48 }
0x275b   :  { %2661 = vpow2.f32 %v2080_v55 }
0x2763   :  { %v2660_v54 = vpop.eup %2659 }
0x2764   :  { %1982 = vrot.lane.b32.xlu0 %v2660_v54, %s2670_s16 }
0x2765   :  { %v2662_v56 = vpop.eup %2661 }
0x2766   :  { %v1976_v57 = vadd.f32 1.0, %v2662_v56 }
0x2768   :  { %2663 = vrcp.f32 %v1976_v57 }
0x2772   :  { %v2664_v58 = vpop.eup %2663 }
0x2773   :  { %v1980_v16 = vmul.f32 %v2664_v58, %v1888_v13 }
0x27d6   :  { %v1983_v59 = vpop.permute.xlu0 %1982 }
0x27d7   :  { %v1985_v60 = vmul.f32 %v2664_v58, %v1983_v59 }
0x27d9   :  { %1987 = vrot.lane.b32.xlu1 %v1985_v60, %s2671_s17 }
0x27dd   :  { %1021 = vrot.lane.b32.xlu1 %v3007_v47, %s2672_s4 }
0x284b   :  { %v1988_v10 = vpop.permute.xlu1 %1987 }
0x284c   :  { %v1990_v61 = vadd.f32 %v1988_v10, %v1980_v16 }
0x284e   :  { %2665 = vtanh.f32 %v1990_v61  ;;  %2004 = vrot.lane.b32.xlu1 %v1990_v61, %s2672_s4 }
0x284f   :  { %v1022_v46 = vpop.permute.xlu1 %1021 }
0x2850   :  { %1024 = vst.msk [vmem:[#allocation4] sm:$0xff] %vm33_vm1, %v1022_v46 }
0x2857   :  { %v2015_v62 = vld [vmem:[#allocation4] sm:$0xff] }
0x2858   :  { %v2666_v63 = vpop.eup %2665  ;;  %2017 = vst.msk [vmem:[%s3150_s9] sm:$0xff] %vm33_vm1, %v2015_v62 }
0x2859   :  { %1993 = vrot.lane.b32.xlu0 %v2666_v63, %s2670_s16 }
0x28c0   :  { %v2005_v1 = vpop.permute.xlu1 %2004 }
0x28c1   :  { %2007 = vst.msk [vmem:[#allocation4 + $0x8] sm:$0xff] %vm33_vm1, %v2005_v1 }
0x28c8   :  { %v2016_v47 = vld [vmem:[#allocation4 + $0x8] sm:$0xff] }
0x28c9   :  { %2018 = vst.msk [vmem:[%s3150_s9 + $0x8] sm:$0xff] %vm33_vm1, %v2016_v47 }
0x28cb   :  { %v1994_v2 = vpop.permute.xlu0 %1993 }
0x28cc   :  { %v1996_v6 = vmul.f32 %v2664_v58, %v1994_v2 }
0x28ce   :  { %1998 = vrot.lane.b32.xlu0 %v1996_v6, %s2671_s17 }
0x2940   :  { %v1999_v7 = vpop.permute.xlu0 %1998 }
0x2941   :  { %2001 = vst.msk [vmem:[%s3148_s7 + $0x38] sm:$0xff] %vm33_vm1, %v1999_v7  ;;  %2002 = vst.msk [vmem:[#allocation3 + $0x8] sm:$0xff] %vm33_vm1, %v1999_v7 }
0x2948   :  { %v2012_v8 = vld [vmem:[#allocation3 + $0x8] sm:$0xff] }
0x2949   :  { %2014 = vst.msk [vmem:[%s3149_s8 + $0x8] sm:$0xff] %vm33_vm1, %v2012_v8 }

</bundles_post_ra>
